<compile_context>
chip_gen: v5e
topology: v5e:2x2
jax: 0.10.0
libtpu: 0.0.40
codegen_flags: <defaults>
</compile_context>

<pallas_src>
import functools

import jax
import jax.numpy as jnp
from jax.experimental import pallas as pl
from jax.experimental.pallas import tpu as pltpu


def _round_up(n, m):
    return (n + m - 1) // m * m


def _crossnetmix_kernel(x_ref, vg_ref, cbd_ref, ut_ref, b_ref, exp_ref, o_ref,
                        *, num_layers, elp, matmul_dtype):
    # x_ref   : (TB, Dp)                batch tile (f32, lane-padded features)
    # vg_ref  : (layers, Dp, ELp + E)   [V block (zero-padded to ELp) | gating]
    # cbd_ref : (layers, ELp, ELp)      block-diagonal C^T, zero-padded
    # ut_ref  : (layers, ELp, Dp)       stacked U^T, zero-padded rows
    # b_ref   : (layers, 1, Dp)         bias
    # exp_ref : (E, ELp)                gate -> low-rank lane expansion matrix
    # o_ref   : (TB, Dp)
    x0 = x_ref[...].astype(jnp.float32)
    x_l = x0
    expand = exp_ref[...]                                    # (E, ELp) f32

    for i in range(num_layers):
        xm = x_l.astype(matmul_dtype)

        # One matmul: all experts' V projections + gating scores.
        fused = jnp.dot(xm, vg_ref[i], preferred_element_type=jnp.float32)
        gate = jax.nn.softmax(fused[:, elp:], axis=-1)       # (TB, E)
        vx = jnp.tanh(fused[:, :elp])                        # (TB, ELp)

        # One matmul: all experts' second low-rank stage (block-diagonal C^T).
        vx = jnp.tanh(jnp.dot(vx.astype(matmul_dtype), cbd_ref[i],
                              preferred_element_type=jnp.float32))

        # Apply the gate in low-rank space: gate_rep[:, e*L + l] == gate[:, e].
        gate_rep = jnp.dot(gate, expand, preferred_element_type=jnp.float32)
        vxg = vx * gate_rep                                  # (TB, ELp)

        # One matmul: all experts' U projection + MoE mixture.
        uv = jnp.dot(vxg.astype(matmul_dtype), ut_ref[i],
                     preferred_element_type=jnp.float32)     # (TB, Dp)

        # softmax gates sum to 1 -> bias factors out of the expert sum.
        x_l = x0 * (uv + b_ref[i]) + x_l

    o_ref[...] = x_l.astype(o_ref.dtype)


def _vmem_capacity_bytes():
    try:
        return int(pltpu.get_tpu_info().vmem_capacity_bytes)
    except Exception:
        return 64 * 1024 * 1024       # conservative: v7x per-TensorCore VMEM


def _footprint_bytes(tb, dp, weight_bytes):
    io = 2 * 2 * tb * dp * 4          # double-buffered x + out batch tiles
    live = 6 * tb * dp * 4            # x0, x_l, fused, uv, epilogue temps (f32)
    return io + live + 2 * weight_bytes


def _choose_batch_tile(batch, dp, weight_bytes, requested, vmem_budget):
    if requested is None:
        requested = 1024 if dp <= 1024 else (512 if dp <= 2048 else 256)
    tb = max(8, _round_up(min(int(requested), _round_up(batch, 8)), 8))
    # Fit the double-buffered pipeline + live intermediates inside VMEM.
    while tb > 8 and _footprint_bytes(tb, dp, weight_bytes) > vmem_budget:
        tb = max(8, _round_up(tb // 2, 8))
    # v7x megacore: keep >= 2 grid steps so the "parallel" axis can shard.
    while tb > 8 and _round_up(batch, tb) // tb < 2:
        tb = max(8, _round_up(tb // 2, 8))
    return tb


def crossnetmix_forward(x, U_list, V_list, C_list, gating_w, bias, *,
                        batch_tile=None, matmul_dtype=jnp.bfloat16):
    """CrossNetMix forward.

    x        : (B, D) float32
    U_list   : (layers, E, D, L)
    V_list   : (layers, E, D, L)
    C_list   : (layers, E, L, L)
    gating_w : (D, E)   stacked gating Linear(D, 1, bias=False) weights
    bias     : (layers, D)
    Returns (B, D), same dtype as x.
    """
    B, D = x.shape
    num_layers, num_experts, _, low_rank = U_list.shape
    EL = num_experts * low_rank
    ELp = _round_up(EL, 128)          # 128-lane-align packed low-rank width
    Dp = _round_up(D, 128)            # lane-align the feature dim
    f32 = jnp.float32

    # ---------- host-side parameter packing (pure layout plumbing) ----------
    # V stacked over experts along the low-rank axis, zero-padded to ELp, with
    # the gating weights folded on starting at the 128-lane boundary ELp.
    V_stk = jnp.swapaxes(V_list, 1, 2).reshape(num_layers, D, EL)
    V_stk = jnp.pad(V_stk.astype(f32), ((0, 0), (0, 0), (0, ELp - EL)))
    gw = jnp.broadcast_to(gating_w[None].astype(f32),
                          (num_layers, D, num_experts))
    VG = jnp.concatenate([V_stk, gw], axis=2)                # (layers,D,ELp+E)
    VG = jnp.pad(VG, ((0, 0), (0, Dp - D), (0, 0)))

    # Block-diagonal C^T (pre-transposed on host), zero-padded to (ELp, ELp).
    CT = jnp.swapaxes(C_list, -1, -2).astype(f32)            # (layers,E,L,L)
    eye_e = jnp.eye(num_experts, dtype=f32)
    Cbd = jnp.einsum('ef,ielm->ielfm', eye_e, CT).reshape(num_layers, EL, EL)
    Cbd = jnp.pad(Cbd, ((0, 0), (0, ELp - EL), (0, ELp - EL)))

    # U^T stacked over experts along the low-rank axis; padded rows are zero
    # so padded low-rank lanes contribute nothing.
    UT = jnp.swapaxes(U_list, -1, -2).reshape(num_layers, EL, D)
    UT = jnp.pad(UT.astype(f32), ((0, 0), (0, ELp - EL), (0, Dp - D)))

    bias_p = jnp.pad(bias.astype(f32), ((0, 0), (0, Dp - D)))
    bias_p = bias_p.reshape(num_layers, 1, Dp)

    # Gate -> low-rank expansion: expand[e, f*L + l] = (e == f); zero-padded.
    expand = jnp.repeat(jnp.eye(num_experts, dtype=f32), low_rank, axis=1)
    expand = jnp.pad(expand, ((0, 0), (0, ELp - EL)))

    VG = VG.astype(matmul_dtype)
    Cbd = Cbd.astype(matmul_dtype)
    UT = UT.astype(matmul_dtype)
    weights = (VG, Cbd, UT, bias_p, expand)
    weight_bytes = sum(int(a.size) * a.dtype.itemsize for a in weights)

    # ---------- generation-aware tiling / VMEM sizing ----------
    vmem_budget = int(_vmem_capacity_bytes() * 0.75)
    tb = _choose_batch_tile(B, Dp, weight_bytes, batch_tile, vmem_budget)
    Bp = _round_up(B, tb)
    vmem_limit = int(min(vmem_budget,
                         max(32 * 1024 * 1024,
                             2 * _footprint_bytes(tb, Dp, weight_bytes))))

    xp = jnp.pad(x, ((0, Bp - B), (0, Dp - D)))

    kernel = functools.partial(_crossnetmix_kernel, num_layers=num_layers,
                               elp=ELp, matmul_dtype=matmul_dtype)

    def run(single_buffer_weights):
        if single_buffer_weights:
            # Constant weights: same block every step -> no 2nd pipeline buffer.
            const = lambda a: pl.BlockSpec(a.shape, lambda i: (0,) * a.ndim,
                                           pipeline_mode=pl.Buffered(1))
        else:
            const = lambda a: pl.BlockSpec(a.shape, lambda i: (0,) * a.ndim)
        return pl.pallas_call(
            kernel,
            out_shape=jax.ShapeDtypeStruct((Bp, Dp), x.dtype),
            grid=(Bp // tb,),
            in_specs=[pl.BlockSpec((tb, Dp), lambda i: (i, 0))]
                    + [const(a) for a in weights],
            out_specs=pl.BlockSpec((tb, Dp), lambda i: (i, 0)),
            compiler_params=pltpu.CompilerParams(
                dimension_semantics=("parallel",),
                vmem_limit_bytes=vmem_limit),
        )(xp, *weights)

    try:
        out = run(True)
    except Exception:
        # pipeline_mode=pl.Buffered unsupported on this jax version; cost is
        # only one extra (never-used) VMEM buffer per tiny weight tensor.
        out = run(False)

    return out[:B, :D]


def crossnetmix_reference(x, U_list, V_list, C_list, gating_w, bias):
    """Pure-JAX reference mirroring the PyTorch forward exactly."""
    x0 = x[..., None]                                      # (B, D, 1)
    x_l = x0
    num_layers, num_experts = U_list.shape[0], U_list.shape[1]
    for i in range(num_layers):
        outs, gates = [], []
        for e in range(num_experts):
            gates.append(jnp.squeeze(x_l, 2) @ gating_w[:, e:e + 1])  # (B,1)
            vx = jnp.tanh(jnp.einsum('ld,bdo->blo', V_list[i, e].T, x_l))
            vx = jnp.tanh(jnp.einsum('kl,blo->bko', C_list[i, e], vx))
            uvx = jnp.einsum('dk,bko->bdo', U_list[i, e], vx)
            dot_ = x0 * (uvx + bias[i][:, None])
            outs.append(jnp.squeeze(dot_, 2))
        outs = jnp.stack(outs, 2)                          # (B, D, E)
        g = jax.nn.softmax(jnp.stack(gates, 1), axis=1)    # (B, E, 1)
        x_l = jnp.matmul(outs, g) + x_l
    return jnp.squeeze(x_l, 2)


if __name__ == "__main__":
    # Small shapes consistent with the module: 2-D input (batch, in_features).
    batch = 32
    in_features = 32
    low_rank = 16
    num_experts = 4
    layer_num = 2

    key = jax.random.PRNGKey(0)
    kx, ku, kv, kc, kg, kb = jax.random.split(key, 6)

    x = jax.random.normal(kx, (batch, in_features), dtype=jnp.float32)

    # Deterministic synthetic parameter init (xavier-normal-ish scales).
    std_uv = (2.0 / (in_features * low_rank + num_experts * low_rank)) ** 0.5
    std_c = (2.0 / (low_rank * low_rank + num_experts * low_rank)) ** 0.5
    U_list = std_uv * jax.random.normal(
        ku, (layer_num, num_experts, in_features, low_rank), dtype=jnp.float32)
    V_list = std_uv * jax.random.normal(
        kv, (layer_num, num_experts, in_features, low_rank), dtype=jnp.float32)
    C_list = std_c * jax.random.normal(
        kc, (layer_num, num_experts, low_rank, low_rank), dtype=jnp.float32)
    # gating: one Linear(in_features, 1, bias=False) per expert, stacked (D, E)
    gating_w = (1.0 / in_features ** 0.5) * jax.random.normal(
        kg, (in_features, num_experts), dtype=jnp.float32)
    # torch inits bias to zeros; use a small non-zero bias so the fused bias
    # path (softmax-sums-to-1 factoring) is actually exercised.
    bias = 0.01 * jax.random.normal(
        kb, (layer_num, in_features), dtype=jnp.float32)

    ref = crossnetmix_reference(x, U_list, V_list, C_list, gating_w, bias)

    # Exact-path check (f32 MXU operands): validates the ELp/Dp packed layout.
    out_f32 = crossnetmix_forward(x, U_list, V_list, C_list, gating_w, bias,
                                  matmul_dtype=jnp.float32)
    out_f32 = jax.block_until_ready(out_f32)
    assert out_f32.shape == (batch, in_features)
    assert jnp.allclose(out_f32, ref, atol=1e-3, rtol=1e-3), (
        float(jnp.max(jnp.abs(out_f32 - ref))))

    # Default fast path (bf16 MXU operands, f32 accumulation / elementwise);
    # tolerance loosened for bf16 operand rounding.
    out = crossnetmix_forward(x, U_list, V_list, C_list, gating_w, bias)
    out = jax.block_until_ready(out)
    assert out.shape == (batch, in_features)
    assert jnp.allclose(out, ref, atol=3e-2, rtol=3e-2), (
        float(jnp.max(jnp.abs(out - ref))))

    print("KERNEL_OK")
</pallas_src>

<mosaic_0001>
module attributes {stable_mosaic.version = 11 : i64} {
  func.func @_crossnetmix_kernel(%arg0: i32, %arg1: memref<16x128xf32, #tpu.memory_space<vmem>>, %arg2: memref<2x128x132xf32, #tpu.memory_space<vmem>>, %arg3: memref<2x128x128xf32, #tpu.memory_space<vmem>>, %arg4: memref<2x128x128xf32, #tpu.memory_space<vmem>>, %arg5: memref<2x1x128xf32, #tpu.memory_space<vmem>>, %arg6: memref<4x128xf32, #tpu.memory_space<vmem>>, %arg7: memref<16x128xf32, #tpu.memory_space<vmem>>) attributes {dimension_semantics = [#tpu.dimension_semantics<parallel>], iteration_bounds = array<i64: 2>, scalar_prefetch = 0 : i64, scratch_operands = 0 : i64, tpu.core_type = #tpu.core_type<tc>, window_params = [{transform_indices = @transform_0, window_bounds = array<i64: 16, 128>}, {pipeline_mode = #tpu.pipeline_mode<synchronous>, transform_indices = @transform_1, window_bounds = array<i64: 2, 128, 132>}, {pipeline_mode = #tpu.pipeline_mode<synchronous>, transform_indices = @transform_2, window_bounds = array<i64: 2, 128, 128>}, {pipeline_mode = #tpu.pipeline_mode<synchronous>, transform_indices = @transform_3, window_bounds = array<i64: 2, 128, 128>}, {pipeline_mode = #tpu.pipeline_mode<synchronous>, transform_indices = @transform_4, window_bounds = array<i64: 2, 1, 128>}, {pipeline_mode = #tpu.pipeline_mode<synchronous>, transform_indices = @transform_5, window_bounds = array<i64: 4, 128>}, {transform_indices = @transform_6, window_bounds = array<i64: 16, 128>}]} {
    %c0 = arith.constant 0 : index
    %c0_0 = arith.constant 0 : index
    %0 = vector.load %arg1[%c0, %c0_0] : memref<16x128xf32, #tpu.memory_space<vmem>>, vector<16x128xf32>
    %c0_1 = arith.constant 0 : index
    %c0_2 = arith.constant 0 : index
    %1 = vector.load %arg6[%c0_1, %c0_2] : memref<4x128xf32, #tpu.memory_space<vmem>>, vector<4x128xf32>
    %c0_3 = arith.constant 0 : index
    %c0_4 = arith.constant 0 : index
    %c0_5 = arith.constant 0 : index
    %2 = vector.load %arg2[%c0_3, %c0_4, %c0_5] : memref<2x128x132xf32, #tpu.memory_space<vmem>>, vector<1x128x132xf32>
    %3 = vector.shape_cast %2 : vector<1x128x132xf32> to vector<128x132xf32>
    %cst = arith.constant dense<0.000000e+00> : vector<16x132xf32>
    %4 = tpu.matmul %0, %3, %cst {dimension_numbers = #tpu.dot_dimension_numbers<[1], [0], [0], [1], [0, 0, 1, 1], [], []>} : vector<16x128xf32>, vector<128x132xf32>, vector<16x132xf32> -> vector<16x132xf32>
    %5 = vector.extract_strided_slice %4 {offsets = [0, 128], sizes = [16, 4], strides = [1, 1]} : vector<16x132xf32> to vector<16x4xf32>
    %cst_6 = arith.constant dense<0xFF800000> : vector<16xf32>
    %6 = vector.multi_reduction <maximumf>, %5, %cst_6 [1] : vector<16x4xf32> to vector<16xf32>
    %cst_7 = arith.constant 0xFF800000 : f32
    %7 = vector.broadcast %cst_7 : f32 to vector<16xf32>
    %8 = arith.maximumf %7, %6 : vector<16xf32>
    %9 = vector.shape_cast %8 : vector<16xf32> to vector<16x1xf32>
    %10 = vector.broadcast %9 : vector<16x1xf32> to vector<16x4xf32>
    %11 = arith.subf %5, %10 : vector<16x4xf32>
    %12 = math.exp %11 : vector<16x4xf32>
    %cst_8 = arith.constant dense<0.000000e+00> : vector<16xf32>
    %13 = vector.multi_reduction <add>, %12, %cst_8 [1] : vector<16x4xf32> to vector<16xf32>
    %14 = vector.shape_cast %13 : vector<16xf32> to vector<16x1xf32>
    %15 = vector.broadcast %14 : vector<16x1xf32> to vector<16x4xf32>
    %16 = arith.divf %12, %15 : vector<16x4xf32>
    %17 = vector.extract_strided_slice %4 {offsets = [0, 0], sizes = [16, 128], strides = [1, 1]} : vector<16x132xf32> to vector<16x128xf32>
    %18 = math.tanh %17 : vector<16x128xf32>
    %c0_9 = arith.constant 0 : index
    %c0_10 = arith.constant 0 : index
    %c0_11 = arith.constant 0 : index
    %19 = vector.load %arg3[%c0_9, %c0_10, %c0_11] : memref<2x128x128xf32, #tpu.memory_space<vmem>>, vector<1x128x128xf32>
    %20 = vector.shape_cast %19 : vector<1x128x128xf32> to vector<128x128xf32>
    %cst_12 = arith.constant dense<0.000000e+00> : vector<16x128xf32>
    %21 = tpu.matmul %18, %20, %cst_12 {dimension_numbers = #tpu.dot_dimension_numbers<[1], [0], [0], [1], [0, 0, 1, 1], [], []>} : vector<16x128xf32>, vector<128x128xf32>, vector<16x128xf32> -> vector<16x128xf32>
    %22 = math.tanh %21 : vector<16x128xf32>
    %cst_13 = arith.constant dense<0.000000e+00> : vector<16x128xf32>
    %23 = tpu.matmul %16, %1, %cst_13 {dimension_numbers = #tpu.dot_dimension_numbers<[1], [0], [0], [1], [0, 0, 1, 1], [], []>} : vector<16x4xf32>, vector<4x128xf32>, vector<16x128xf32> -> vector<16x128xf32>
    %24 = arith.mulf %22, %23 : vector<16x128xf32>
    %c0_14 = arith.constant 0 : index
    %c0_15 = arith.constant 0 : index
    %c0_16 = arith.constant 0 : index
    %25 = vector.load %arg4[%c0_14, %c0_15, %c0_16] : memref<2x128x128xf32, #tpu.memory_space<vmem>>, vector<1x128x128xf32>
    %26 = vector.shape_cast %25 : vector<1x128x128xf32> to vector<128x128xf32>
    %cst_17 = arith.constant dense<0.000000e+00> : vector<16x128xf32>
    %27 = tpu.matmul %24, %26, %cst_17 {dimension_numbers = #tpu.dot_dimension_numbers<[1], [0], [0], [1], [0, 0, 1, 1], [], []>} : vector<16x128xf32>, vector<128x128xf32>, vector<16x128xf32> -> vector<16x128xf32>
    %c0_18 = arith.constant 0 : index
    %c0_19 = arith.constant 0 : index
    %c0_20 = arith.constant 0 : index
    %28 = vector.load %arg5[%c0_18, %c0_19, %c0_20] : memref<2x1x128xf32, #tpu.memory_space<vmem>>, vector<1x1x128xf32>
    %29 = vector.shape_cast %28 : vector<1x1x128xf32> to vector<1x128xf32>
    %30 = vector.broadcast %29 : vector<1x128xf32> to vector<16x128xf32>
    %31 = arith.addf %27, %30 : vector<16x128xf32>
    %32 = arith.mulf %0, %31 : vector<16x128xf32>
    %33 = arith.addf %32, %0 : vector<16x128xf32>
    %c1 = arith.constant 1 : index
    %c0_21 = arith.constant 0 : index
    %c0_22 = arith.constant 0 : index
    %34 = vector.load %arg2[%c1, %c0_21, %c0_22] : memref<2x128x132xf32, #tpu.memory_space<vmem>>, vector<1x128x132xf32>
    %35 = vector.shape_cast %34 : vector<1x128x132xf32> to vector<128x132xf32>
    %cst_23 = arith.constant dense<0.000000e+00> : vector<16x132xf32>
    %36 = tpu.matmul %33, %35, %cst_23 {dimension_numbers = #tpu.dot_dimension_numbers<[1], [0], [0], [1], [0, 0, 1, 1], [], []>} : vector<16x128xf32>, vector<128x132xf32>, vector<16x132xf32> -> vector<16x132xf32>
    %37 = vector.extract_strided_slice %36 {offsets = [0, 128], sizes = [16, 4], strides = [1, 1]} : vector<16x132xf32> to vector<16x4xf32>
    %cst_24 = arith.constant dense<0xFF800000> : vector<16xf32>
    %38 = vector.multi_reduction <maximumf>, %37, %cst_24 [1] : vector<16x4xf32> to vector<16xf32>
    %cst_25 = arith.constant 0xFF800000 : f32
    %39 = vector.broadcast %cst_25 : f32 to vector<16xf32>
    %40 = arith.maximumf %39, %38 : vector<16xf32>
    %41 = vector.shape_cast %40 : vector<16xf32> to vector<16x1xf32>
    %42 = vector.broadcast %41 : vector<16x1xf32> to vector<16x4xf32>
    %43 = arith.subf %37, %42 : vector<16x4xf32>
    %44 = math.exp %43 : vector<16x4xf32>
    %cst_26 = arith.constant dense<0.000000e+00> : vector<16xf32>
    %45 = vector.multi_reduction <add>, %44, %cst_26 [1] : vector<16x4xf32> to vector<16xf32>
    %46 = vector.shape_cast %45 : vector<16xf32> to vector<16x1xf32>
    %47 = vector.broadcast %46 : vector<16x1xf32> to vector<16x4xf32>
    %48 = arith.divf %44, %47 : vector<16x4xf32>
    %49 = vector.extract_strided_slice %36 {offsets = [0, 0], sizes = [16, 128], strides = [1, 1]} : vector<16x132xf32> to vector<16x128xf32>
    %50 = math.tanh %49 : vector<16x128xf32>
    %c1_27 = arith.constant 1 : index
    %c0_28 = arith.constant 0 : index
    %c0_29 = arith.constant 0 : index
    %51 = vector.load %arg3[%c1_27, %c0_28, %c0_29] : memref<2x128x128xf32, #tpu.memory_space<vmem>>, vector<1x128x128xf32>
    %52 = vector.shape_cast %51 : vector<1x128x128xf32> to vector<128x128xf32>
    %cst_30 = arith.constant dense<0.000000e+00> : vector<16x128xf32>
    %53 = tpu.matmul %50, %52, %cst_30 {dimension_numbers = #tpu.dot_dimension_numbers<[1], [0], [0], [1], [0, 0, 1, 1], [], []>} : vector<16x128xf32>, vector<128x128xf32>, vector<16x128xf32> -> vector<16x128xf32>
    %54 = math.tanh %53 : vector<16x128xf32>
    %cst_31 = arith.constant dense<0.000000e+00> : vector<16x128xf32>
    %55 = tpu.matmul %48, %1, %cst_31 {dimension_numbers = #tpu.dot_dimension_numbers<[1], [0], [0], [1], [0, 0, 1, 1], [], []>} : vector<16x4xf32>, vector<4x128xf32>, vector<16x128xf32> -> vector<16x128xf32>
    %56 = arith.mulf %54, %55 : vector<16x128xf32>
    %c1_32 = arith.constant 1 : index
    %c0_33 = arith.constant 0 : index
    %c0_34 = arith.constant 0 : index
    %57 = vector.load %arg4[%c1_32, %c0_33, %c0_34] : memref<2x128x128xf32, #tpu.memory_space<vmem>>, vector<1x128x128xf32>
    %58 = vector.shape_cast %57 : vector<1x128x128xf32> to vector<128x128xf32>
    %cst_35 = arith.constant dense<0.000000e+00> : vector<16x128xf32>
    %59 = tpu.matmul %56, %58, %cst_35 {dimension_numbers = #tpu.dot_dimension_numbers<[1], [0], [0], [1], [0, 0, 1, 1], [], []>} : vector<16x128xf32>, vector<128x128xf32>, vector<16x128xf32> -> vector<16x128xf32>
    %c1_36 = arith.constant 1 : index
    %c0_37 = arith.constant 0 : index
    %c0_38 = arith.constant 0 : index
    %60 = vector.load %arg5[%c1_36, %c0_37, %c0_38] : memref<2x1x128xf32, #tpu.memory_space<vmem>>, vector<1x1x128xf32>
    %61 = vector.shape_cast %60 : vector<1x1x128xf32> to vector<1x128xf32>
    %62 = vector.broadcast %61 : vector<1x128xf32> to vector<16x128xf32>
    %63 = arith.addf %59, %62 : vector<16x128xf32>
    %64 = arith.mulf %0, %63 : vector<16x128xf32>
    %65 = arith.addf %64, %33 : vector<16x128xf32>
    %c0_39 = arith.constant 0 : index
    %c0_40 = arith.constant 0 : index
    %66 = vector.load %arg7[%c0_39, %c0_40] : memref<16x128xf32, #tpu.memory_space<vmem>>, vector<16x128xf32>
    tpu.vector_store %arg7[%c0_39, %c0_40], %65 {strides = array<i32>} : memref<16x128xf32, #tpu.memory_space<vmem>>, vector<16x128xf32>,
    return
  }
  func.func @transform_0(%arg0: i32) -> (i32, i32) {
    %c0_i32 = arith.constant 0 : i32
    %c0_i32_0 = arith.constant 0 : i32
    return %arg0, %c0_i32 : i32, i32
  }
  func.func @transform_1(%arg0: i32) -> (i32, i32, i32) {
    %c0_i32 = arith.constant 0 : i32
    %c0_i32_0 = arith.constant 0 : i32
    %c0_i32_1 = arith.constant 0 : i32
    %c0_i32_2 = arith.constant 0 : i32
    return %c0_i32, %c0_i32_0, %c0_i32_1 : i32, i32, i32
  }
  func.func @transform_2(%arg0: i32) -> (i32, i32, i32) {
    %c0_i32 = arith.constant 0 : i32
    %c0_i32_0 = arith.constant 0 : i32
    %c0_i32_1 = arith.constant 0 : i32
    %c0_i32_2 = arith.constant 0 : i32
    return %c0_i32, %c0_i32_0, %c0_i32_1 : i32, i32, i32
  }
  func.func @transform_3(%arg0: i32) -> (i32, i32, i32) {
    %c0_i32 = arith.constant 0 : i32
    %c0_i32_0 = arith.constant 0 : i32
    %c0_i32_1 = arith.constant 0 : i32
    %c0_i32_2 = arith.constant 0 : i32
    return %c0_i32, %c0_i32_0, %c0_i32_1 : i32, i32, i32
  }
  func.func @transform_4(%arg0: i32) -> (i32, i32, i32) {
    %c0_i32 = arith.constant 0 : i32
    %c0_i32_0 = arith.constant 0 : i32
    %c0_i32_1 = arith.constant 0 : i32
    %c0_i32_2 = arith.constant 0 : i32
    return %c0_i32, %c0_i32_0, %c0_i32_1 : i32, i32, i32
  }
  func.func @transform_5(%arg0: i32) -> (i32, i32) {
    %c0_i32 = arith.constant 0 : i32
    %c0_i32_0 = arith.constant 0 : i32
    %c0_i32_1 = arith.constant 0 : i32
    return %c0_i32, %c0_i32_0 : i32, i32
  }
  func.func @transform_6(%arg0: i32) -> (i32, i32) {
    %c0_i32 = arith.constant 0 : i32
    %c0_i32_0 = arith.constant 0 : i32
    return %arg0, %c0_i32 : i32, i32
  }
}

module attributes {stable_mosaic.version = 11 : i64} {
  func.func @_crossnetmix_kernel(%arg0: i32, %arg1: memref<16x128xf32, #tpu.memory_space<vmem>>, %arg2: memref<2x128x132xf32, #tpu.memory_space<vmem>>, %arg3: memref<2x128x128xf32, #tpu.memory_space<vmem>>, %arg4: memref<2x128x128xf32, #tpu.memory_space<vmem>>, %arg5: memref<2x1x128xf32, #tpu.memory_space<vmem>>, %arg6: memref<4x128xf32, #tpu.memory_space<vmem>>, %arg7: memref<16x128xf32, #tpu.memory_space<vmem>>) attributes {dimension_semantics = [#tpu.dimension_semantics<parallel>], iteration_bounds = array<i64: 2>, scalar_prefetch = 0 : i64, scratch_operands = 0 : i64, tpu.core_type = #tpu.core_type<tc>, window_params = [{transform_indices = @transform_0, window_bounds = array<i64: 16, 128>}, {pipeline_mode = #tpu.pipeline_mode<synchronous>, transform_indices = @transform_1, window_bounds = array<i64: 2, 128, 132>}, {pipeline_mode = #tpu.pipeline_mode<synchronous>, transform_indices = @transform_2, window_bounds = array<i64: 2, 128, 128>}, {pipeline_mode = #tpu.pipeline_mode<synchronous>, transform_indices = @transform_3, window_bounds = array<i64: 2, 128, 128>}, {pipeline_mode = #tpu.pipeline_mode<synchronous>, transform_indices = @transform_4, window_bounds = array<i64: 2, 1, 128>}, {pipeline_mode = #tpu.pipeline_mode<synchronous>, transform_indices = @transform_5, window_bounds = array<i64: 4, 128>}, {transform_indices = @transform_6, window_bounds = array<i64: 16, 128>}]} {
    %c0 = arith.constant 0 : index
    %c0_0 = arith.constant 0 : index
    %0 = vector.load %arg1[%c0, %c0_0] : memref<16x128xf32, #tpu.memory_space<vmem>>, vector<16x128xf32>
    %c0_1 = arith.constant 0 : index
    %c0_2 = arith.constant 0 : index
    %1 = vector.load %arg6[%c0_1, %c0_2] : memref<4x128xf32, #tpu.memory_space<vmem>>, vector<4x128xf32>
    %c0_3 = arith.constant 0 : index
    %c0_4 = arith.constant 0 : index
    %c0_5 = arith.constant 0 : index
    %2 = vector.load %arg2[%c0_3, %c0_4, %c0_5] : memref<2x128x132xf32, #tpu.memory_space<vmem>>, vector<1x128x132xf32>
    %3 = vector.shape_cast %2 : vector<1x128x132xf32> to vector<128x132xf32>
    %cst = arith.constant dense<0.000000e+00> : vector<16x132xf32>
    %4 = tpu.matmul %0, %3, %cst {dimension_numbers = #tpu.dot_dimension_numbers<[1], [0], [0], [1], [0, 0, 1, 1], [], []>} : vector<16x128xf32>, vector<128x132xf32>, vector<16x132xf32> -> vector<16x132xf32>
    %5 = vector.extract_strided_slice %4 {offsets = [0, 128], sizes = [16, 4], strides = [1, 1]} : vector<16x132xf32> to vector<16x4xf32>
    %cst_6 = arith.constant dense<0xFF800000> : vector<16xf32>
    %6 = vector.multi_reduction <maximumf>, %5, %cst_6 [1] : vector<16x4xf32> to vector<16xf32>
    %cst_7 = arith.constant 0xFF800000 : f32
    %7 = vector.broadcast %cst_7 : f32 to vector<16xf32>
    %8 = arith.maximumf %7, %6 : vector<16xf32>
    %9 = vector.shape_cast %8 : vector<16xf32> to vector<16x1xf32>
    %10 = vector.broadcast %9 : vector<16x1xf32> to vector<16x4xf32>
    %11 = arith.subf %5, %10 : vector<16x4xf32>
    %12 = math.exp %11 : vector<16x4xf32>
    %cst_8 = arith.constant dense<0.000000e+00> : vector<16xf32>
    %13 = vector.multi_reduction <add>, %12, %cst_8 [1] : vector<16x4xf32> to vector<16xf32>
    %14 = vector.shape_cast %13 : vector<16xf32> to vector<16x1xf32>
    %15 = vector.broadcast %14 : vector<16x1xf32> to vector<16x4xf32>
    %16 = arith.divf %12, %15 : vector<16x4xf32>
    %17 = vector.extract_strided_slice %4 {offsets = [0, 0], sizes = [16, 128], strides = [1, 1]} : vector<16x132xf32> to vector<16x128xf32>
    %18 = math.tanh %17 : vector<16x128xf32>
    %c0_9 = arith.constant 0 : index
    %c0_10 = arith.constant 0 : index
    %c0_11 = arith.constant 0 : index
    %19 = vector.load %arg3[%c0_9, %c0_10, %c0_11] : memref<2x128x128xf32, #tpu.memory_space<vmem>>, vector<1x128x128xf32>
    %20 = vector.shape_cast %19 : vector<1x128x128xf32> to vector<128x128xf32>
    %cst_12 = arith.constant dense<0.000000e+00> : vector<16x128xf32>
    %21 = tpu.matmul %18, %20, %cst_12 {dimension_numbers = #tpu.dot_dimension_numbers<[1], [0], [0], [1], [0, 0, 1, 1], [], []>} : vector<16x128xf32>, vector<128x128xf32>, vector<16x128xf32> -> vector<16x128xf32>
    %22 = math.tanh %21 : vector<16x128xf32>
    %cst_13 = arith.constant dense<0.000000e+00> : vector<16x128xf32>
    %23 = tpu.matmul %16, %1, %cst_13 {dimension_numbers = #tpu.dot_dimension_numbers<[1], [0], [0], [1], [0, 0, 1, 1], [], []>} : vector<16x4xf32>, vector<4x128xf32>, vector<16x128xf32> -> vector<16x128xf32>
    %24 = arith.mulf %22, %23 : vector<16x128xf32>
    %c0_14 = arith.constant 0 : index
    %c0_15 = arith.constant 0 : index
    %c0_16 = arith.constant 0 : index
    %25 = vector.load %arg4[%c0_14, %c0_15, %c0_16] : memref<2x128x128xf32, #tpu.memory_space<vmem>>, vector<1x128x128xf32>
    %26 = vector.shape_cast %25 : vector<1x128x128xf32> to vector<128x128xf32>
    %cst_17 = arith.constant dense<0.000000e+00> : vector<16x128xf32>
    %27 = tpu.matmul %24, %26, %cst_17 {dimension_numbers = #tpu.dot_dimension_numbers<[1], [0], [0], [1], [0, 0, 1, 1], [], []>} : vector<16x128xf32>, vector<128x128xf32>, vector<16x128xf32> -> vector<16x128xf32>
    %c0_18 = arith.constant 0 : index
    %c0_19 = arith.constant 0 : index
    %c0_20 = arith.constant 0 : index
    %28 = vector.load %arg5[%c0_18, %c0_19, %c0_20] : memref<2x1x128xf32, #tpu.memory_space<vmem>>, vector<1x1x128xf32>
    %29 = vector.shape_cast %28 : vector<1x1x128xf32> to vector<1x128xf32>
    %30 = vector.broadcast %29 : vector<1x128xf32> to vector<16x128xf32>
    %31 = arith.addf %27, %30 : vector<16x128xf32>
    %32 = arith.mulf %0, %31 : vector<16x128xf32>
    %33 = arith.addf %32, %0 : vector<16x128xf32>
    %c1 = arith.constant 1 : index
    %c0_21 = arith.constant 0 : index
    %c0_22 = arith.constant 0 : index
    %34 = vector.load %arg2[%c1, %c0_21, %c0_22] : memref<2x128x132xf32, #tpu.memory_space<vmem>>, vector<1x128x132xf32>
    %35 = vector.shape_cast %34 : vector<1x128x132xf32> to vector<128x132xf32>
    %cst_23 = arith.constant dense<0.000000e+00> : vector<16x132xf32>
    %36 = tpu.matmul %33, %35, %cst_23 {dimension_numbers = #tpu.dot_dimension_numbers<[1], [0], [0], [1], [0, 0, 1, 1], [], []>} : vector<16x128xf32>, vector<128x132xf32>, vector<16x132xf32> -> vector<16x132xf32>
    %37 = vector.extract_strided_slice %36 {offsets = [0, 128], sizes = [16, 4], strides = [1, 1]} : vector<16x132xf32> to vector<16x4xf32>
    %cst_24 = arith.constant dense<0xFF800000> : vector<16xf32>
    %38 = vector.multi_reduction <maximumf>, %37, %cst_24 [1] : vector<16x4xf32> to vector<16xf32>
    %cst_25 = arith.constant 0xFF800000 : f32
    %39 = vector.broadcast %cst_25 : f32 to vector<16xf32>
    %40 = arith.maximumf %39, %38 : vector<16xf32>
    %41 = vector.shape_cast %40 : vector<16xf32> to vector<16x1xf32>
    %42 = vector.broadcast %41 : vector<16x1xf32> to vector<16x4xf32>
    %43 = arith.subf %37, %42 : vector<16x4xf32>
    %44 = math.exp %43 : vector<16x4xf32>
    %cst_26 = arith.constant dense<0.000000e+00> : vector<16xf32>
    %45 = vector.multi_reduction <add>, %44, %cst_26 [1] : vector<16x4xf32> to vector<16xf32>
    %46 = vector.shape_cast %45 : vector<16xf32> to vector<16x1xf32>
    %47 = vector.broadcast %46 : vector<16x1xf32> to vector<16x4xf32>
    %48 = arith.divf %44, %47 : vector<16x4xf32>
    %49 = vector.extract_strided_slice %36 {offsets = [0, 0], sizes = [16, 128], strides = [1, 1]} : vector<16x132xf32> to vector<16x128xf32>
    %50 = math.tanh %49 : vector<16x128xf32>
    %c1_27 = arith.constant 1 : index
    %c0_28 = arith.constant 0 : index
    %c0_29 = arith.constant 0 : index
    %51 = vector.load %arg3[%c1_27, %c0_28, %c0_29] : memref<2x128x128xf32, #tpu.memory_space<vmem>>, vector<1x128x128xf32>
    %52 = vector.shape_cast %51 : vector<1x128x128xf32> to vector<128x128xf32>
    %cst_30 = arith.constant dense<0.000000e+00> : vector<16x128xf32>
    %53 = tpu.matmul %50, %52, %cst_30 {dimension_numbers = #tpu.dot_dimension_numbers<[1], [0], [0], [1], [0, 0, 1, 1], [], []>} : vector<16x128xf32>, vector<128x128xf32>, vector<16x128xf32> -> vector<16x128xf32>
    %54 = math.tanh %53 : vector<16x128xf32>
    %cst_31 = arith.constant dense<0.000000e+00> : vector<16x128xf32>
    %55 = tpu.matmul %48, %1, %cst_31 {dimension_numbers = #tpu.dot_dimension_numbers<[1], [0], [0], [1], [0, 0, 1, 1], [], []>} : vector<16x4xf32>, vector<4x128xf32>, vector<16x128xf32> -> vector<16x128xf32>
    %56 = arith.mulf %54, %55 : vector<16x128xf32>
    %c1_32 = arith.constant 1 : index
    %c0_33 = arith.constant 0 : index
    %c0_34 = arith.constant 0 : index
    %57 = vector.load %arg4[%c1_32, %c0_33, %c0_34] : memref<2x128x128xf32, #tpu.memory_space<vmem>>, vector<1x128x128xf32>
    %58 = vector.shape_cast %57 : vector<1x128x128xf32> to vector<128x128xf32>
    %cst_35 = arith.constant dense<0.000000e+00> : vector<16x128xf32>
    %59 = tpu.matmul %56, %58, %cst_35 {dimension_numbers = #tpu.dot_dimension_numbers<[1], [0], [0], [1], [0, 0, 1, 1], [], []>} : vector<16x128xf32>, vector<128x128xf32>, vector<16x128xf32> -> vector<16x128xf32>
    %c1_36 = arith.constant 1 : index
    %c0_37 = arith.constant 0 : index
    %c0_38 = arith.constant 0 : index
    %60 = vector.load %arg5[%c1_36, %c0_37, %c0_38] : memref<2x1x128xf32, #tpu.memory_space<vmem>>, vector<1x1x128xf32>
    %61 = vector.shape_cast %60 : vector<1x1x128xf32> to vector<1x128xf32>
    %62 = vector.broadcast %61 : vector<1x128xf32> to vector<16x128xf32>
    %63 = arith.addf %59, %62 : vector<16x128xf32>
    %64 = arith.mulf %0, %63 : vector<16x128xf32>
    %65 = arith.addf %64, %33 : vector<16x128xf32>
    %c0_39 = arith.constant 0 : index
    %c0_40 = arith.constant 0 : index
    %66 = vector.load %arg7[%c0_39, %c0_40] : memref<16x128xf32, #tpu.memory_space<vmem>>, vector<16x128xf32>
    tpu.vector_store %arg7[%c0_39, %c0_40], %65 {strides = array<i32>} : memref<16x128xf32, #tpu.memory_space<vmem>>, vector<16x128xf32>,
    return
  }
  func.func @transform_0(%arg0: i32) -> (i32, i32) {
    %c0_i32 = arith.constant 0 : i32
    %c0_i32_0 = arith.constant 0 : i32
    return %arg0, %c0_i32 : i32, i32
  }
  func.func @transform_1(%arg0: i32) -> (i32, i32, i32) {
    %c0_i32 = arith.constant 0 : i32
    %c0_i32_0 = arith.constant 0 : i32
    %c0_i32_1 = arith.constant 0 : i32
    %c0_i32_2 = arith.constant 0 : i32
    return %c0_i32, %c0_i32_0, %c0_i32_1 : i32, i32, i32
  }
  func.func @transform_2(%arg0: i32) -> (i32, i32, i32) {
    %c0_i32 = arith.constant 0 : i32
    %c0_i32_0 = arith.constant 0 : i32
    %c0_i32_1 = arith.constant 0 : i32
    %c0_i32_2 = arith.constant 0 : i32
    return %c0_i32, %c0_i32_0, %c0_i32_1 : i32, i32, i32
  }
  func.func @transform_3(%arg0: i32) -> (i32, i32, i32) {
    %c0_i32 = arith.constant 0 : i32
    %c0_i32_0 = arith.constant 0 : i32
    %c0_i32_1 = arith.constant 0 : i32
    %c0_i32_2 = arith.constant 0 : i32
    return %c0_i32, %c0_i32_0, %c0_i32_1 : i32, i32, i32
  }
  func.func @transform_4(%arg0: i32) -> (i32, i32, i32) {
    %c0_i32 = arith.constant 0 : i32
    %c0_i32_0 = arith.constant 0 : i32
    %c0_i32_1 = arith.constant 0 : i32
    %c0_i32_2 = arith.constant 0 : i32
    return %c0_i32, %c0_i32_0, %c0_i32_1 : i32, i32, i32
  }
  func.func @transform_5(%arg0: i32) -> (i32, i32) {
    %c0_i32 = arith.constant 0 : i32
    %c0_i32_0 = arith.constant 0 : i32
    %c0_i32_1 = arith.constant 0 : i32
    return %c0_i32, %c0_i32_0 : i32, i32
  }
  func.func @transform_6(%arg0: i32) -> (i32, i32) {
    %c0_i32 = arith.constant 0 : i32
    %c0_i32_0 = arith.constant 0 : i32
    return %arg0, %c0_i32 : i32, i32
  }
}

</mosaic_0001>

<bundles_post_ra>
// kernel: tpu_custom_call.1
= control target key start
LH: loop header
LB: loop body
LE: loop exit
PB: predicated region body
PF: predicated region fallthrough
CT: control target
= control target key end

     0   :  { %11 = vsyncpa [#allocation3], 0  ;;  %s1630_s0 = inlined_call_operand.vmem [shape: f32[32,128], index: 0, kind: input, shape index: {}]   ;;  %s1631_s1 = inlined_call_operand.vmem [shape: f32[2,128,132], index: 1, kind: input, shape index: {}]   ;;  %s1632_s2 = inlined_call_operand.vmem [shape: f32[2,128,128], index: 2, kind: input, shape index: {}]   ;;  %s1633_s3 = inlined_call_operand.vmem [shape: f32[2,128,128], index: 3, kind: input, shape index: {}]   ;;  %s1634_s4 = inlined_call_operand.vmem [shape: f32[2,1,128], index: 4, kind: input, shape index: {}]   ;;  %s1635_s5 = inlined_call_operand.vmem [shape: f32[4,128], index: 5, kind: input, shape index: {}]   ;;  %s1636_s6 = inlined_call_operand.hbm [shape: f32[32,128], index: 6, kind: output, shape index: {}]  }
   0x1   :  { %13 = vsyncpa [#allocation3 + $0x1], 0  ;;  %s1099_s21 = smov 0   ;;  %s1101_s22 = smov 0  }
   0x2   :  { %s1103_s23 = smov 0   ;;  %s1105_s24 = smov 0  }
   0x3 LB: > { %s1120_s25 = sadd.s32 4294967295, %s1060_s24   ;;  %s839_s26 = sadd.s32 4294967294, %s1060_s24   ;;  %s1060_s24 = sphi %s1105_s24, %s1642_s24   ;;  %s1056_s23 = sphi %s1103_s23, %s1641_s23   ;;  %s1052_s22 = sphi %s1101_s22, %s1640_s22   ;;  %s1048_s21 = sphi %s1099_s21, %s1639_s21  }
   0x4   : > { %s1124_s27 = sadd.s32 1, %s1060_s24   ;;  %s157_s28 = sadd.s32 1, %s1056_s23 }
   0x5   : > { %s154_s29 = ssub.s32 %s1060_s24, %s1124_s27  ;;  %p167_p0 = scmp.ne.s32.totalorder %s1056_s23, %s1052_s22 }
   0x6   : > { %p155_p1 = scmp.eq.s32.totalorder %s154_s29, 0  ;;  %p168_p2 = scmp.eq.s32.totalorder %s1120_s25, 1 }
   0x7   : > { %p173_p3 = scmp.ne.s32.totalorder %s1052_s22, %s1048_s21  ;;  %p174_p4 = scmp.eq.s32.totalorder %s839_s26, 1 }
   0x8   : > { %s1135_s30 = scalar_select %p155_p1, %s1056_s23, %s157_s28  }
   0x9   : > { %p1137_p5 = por %p168_p2, %p167_p0  ;;  %p1141_p6 = por %p174_p4, %p173_p3 }
   0xa   : > { %p842_p7 = scmp.ge.s32.totalorder %s1060_s24, 1  ;;  %p216_p8 = scmp.lt.s32.totalorder %s1060_s24, 3 }
   0xc   : > { %p217_p9 = pnand %p842_p7, %p216_p8 }
   0xd   : > { %s844_s10 = sshll.u32 (!%p217_p9), %s1120_s25, 1  ;;  %s922_s29 = sshll.u32 (!%p217_p9), %s1120_s25, 4 }
   0xe   : > { %220 = sbr.rel (%p217_p9) target bundleno = 1381 (0x565), region = 44  ;;  %p247_p10 = scmp.lt.s32.totalorder (!%p217_p9), %s844_s10, 3 }
   0xf   : > { %s773_s12 = scalar_lea.hbm (!%p217_p9), %s1636_s6, %s922_s29  ;;  %s1018_s19 = scalar_lea.hbm (!%p217_p9), %s1636_s6, 32 }
  0x10   : > { %s776_s15 = sshll.u32 (!%p217_p9), %s773_s12, 4  ;;  %s777_s15 = int_to_ptr.hbm [resolvable:$true] %s776_s15 }
  0x11   : > { %s1012_s16 = sshra.s32 (!%p217_p9), %s777_s15, 4  ;;  %s1013_s16 = int_to_ptr.hbm [resolvable:$true] %s1012_s16 }
  0x12   : > { %p1019_p0 = scmp.lt.s32.totalorder (!%p217_p9), %s1013_s16, %s1636_s6 }
  0x13   : > { %v287_v0 = vld [vmem:[%s1631_s1 + $0xf8] sm:$0xff]  ;;  %v285_v1 = vld [vmem:[%s1631_s1 + $0xe8] sm:$0xff]  ;;  %s1644_s10 = smov (!%p247_p10, %s844_s10), 3  ;;  %v286_v18 = vld [vmem:[%s1631_s1 + $0xf0] sm:$0xff]  ;;  %vm334_vm0 = vcmask 31744   ;;  %vm432_vm1 = vcmask 1043456  }
  0x14   : > { %311 = vmatpush.msra.mxu1 %v287_v0  ;;  %v283_v2 = vld [vmem:[%s1631_s1 + $0xd8] sm:$0xff]  ;;  %v281_v3 = vld [vmem:[%s1631_s1 + $0xc8] sm:$0xff]  ;;  %s845_s26 = sshll.u32 %s1644_s10, 3  ;;  %v284_v19 = vld [vmem:[%s1631_s1 + $0xe0] sm:$0xff]  ;;  %288 = vmatpush.msra.mxu0 %v286_v18  ;;  %s1014_s10 = scalar_lea.hbm %s1013_s16, 16 }
  0x15   : > { %v279_v4 = vld [vmem:[%s1631_s1 + $0xb8] sm:$0xff]  ;;  %v277_v5 = vld [vmem:[%s1631_s1 + $0xa8] sm:$0xff]  ;;  %s250_s14 = scalar_lea.vmem %s1630_s0, %s845_s26  ;;  %v282_v20 = vld [vmem:[%s1631_s1 + $0xd0] sm:$0xff]  ;;  %s243_s26 = sand.u32 1, %s1052_s22  }
  0x16   : > { %312 = vmatpush.msra.mxu1 %v285_v1  ;;  %v275_v6 = vld [vmem:[%s1631_s1 + $0x98] sm:$0xff]  ;;  %v273_v7 = vld [vmem:[%s1631_s1 + $0x88] sm:$0xff]  ;;  %v1199_v16 = vld [vmem:[%s250_s14] sm:$0xff]  ;;  %289 = vmatpush.msra.mxu0 %v284_v19  ;;  %s843_s28 = sshll.u32 %s243_s26, 4  ;;  %s762_s25 = scalar_lea.sflag [#allocation3], %s243_s26 }
  0x17   : > { %v271_v8 = vld [vmem:[%s1631_s1 + $0x78] sm:$0xff]  ;;  %v269_v9 = vld [vmem:[%s1631_s1 + $0x68] sm:$0xff]  ;;  %v280_v21 = vld [vmem:[%s1631_s1 + $0xc0] sm:$0xff]  ;;  %s245_s13 = scalar_lea.vmem [#allocation2], %s843_s28  ;;  %p1015_p11 = scmp.ne.s32.totalorder %s1013_s16, %s1014_s10 }
  0x18   : > { %313 = vmatpush.msra.mxu1 %v283_v2  ;;  %v267_v10 = vld [vmem:[%s1631_s1 + $0x58] sm:$0xff]  ;;  %v265_v11 = vld [vmem:[%s1631_s1 + $0x48] sm:$0xff]  ;;  %290 = vmatpush.msra.mxu0 %v282_v20  ;;  %v278_v22 = vld [vmem:[%s1631_s1 + $0xb0] sm:$0xff]  ;;  %p1020_p1 = scmp.lt.s32.totalorder %s1018_s19, %s1014_s10 }
  0x19   : > { %v263_v12 = vld [vmem:[%s1631_s1 + $0x38] sm:$0xff]  ;;  %v261_v13 = vld [vmem:[%s1631_s1 + $0x28] sm:$0xff]  ;;  %v276_v23 = vld [vmem:[%s1631_s1 + $0xa0] sm:$0xff]  ;;  %p1016_p12 = pnand %p1015_p11, %p1137_p5 }
  0x1a   : > { %314 = vmatpush.msra.mxu1 %v281_v3  ;;  %v259_v14 = vld [vmem:[%s1631_s1 + $0x18] sm:$0xff]  ;;  %v257_v15 = vld [vmem:[%s1631_s1 + $0x8] sm:$0xff]  ;;  %291 = vmatpush.msra.mxu0 %v280_v21  ;;  %v274_v24 = vld [vmem:[%s1631_s1 + $0x90] sm:$0xff]  ;;  %p1021_p2 = por %p1020_p1, %p1019_p0 }
  0x1b   : > { %v1202_v17 = vld [vmem:[%s250_s14 + $0x8] sm:$0xff]  ;;  %v272_v25 = vld [vmem:[%s1631_s1 + $0x80] sm:$0xff]  ;;  %v270_v26 = vld [vmem:[%s1631_s1 + $0x70] sm:$0xff]  ;;  %s774_s14 = sshll.u32 %s245_s13, 4  ;;  %p1017_p13 = pneg %p1016_p12  ;;  %s775_s14 = int_to_ptr.vmem [resolvable:$true] %s774_s14 }
  0x1c   : > { %315 = vmatpush.msra.mxu1 %v279_v4  ;;  %292 = vmatpush.msra.mxu0 %v278_v22  ;;  %v268_v27 = vld [vmem:[%s1631_s1 + $0x60] sm:$0xff]  ;;  %v266_v28 = vld [vmem:[%s1631_s1 + $0x50] sm:$0xff]  ;;  %v400_v38 = vld [vmem:[%s1632_s2 + $0x78] sm:$0xff] }
  0x1d   : > { %v264_v29 = vld [vmem:[%s1631_s1 + $0x40] sm:$0xff]  ;;  %v262_v31 = vld [vmem:[%s1631_s1 + $0x30] sm:$0xff]  ;;  %401 = vmatpush.msra.mxu2 %v400_v38  ;;  %v398_v40 = vld [vmem:[%s1632_s2 + $0x68] sm:$0xff]  ;;  %p1022_p3 = pnand %p1021_p2, %p1017_p13 }
  0x1e   : > { %316 = vmatpush.msra.mxu1 %v277_v5  ;;  %293 = vmatpush.msra.mxu0 %v276_v23  ;;  %v260_v33 = vld [vmem:[%s1631_s1 + $0x20] sm:$0xff]  ;;  %v258_v34 = vld [vmem:[%s1631_s1 + $0x10] sm:$0xff]  ;;  %v396_v42 = vld [vmem:[%s1632_s2 + $0x58] sm:$0xff] }
  0x1f   : > { %v256_v37 = vld [vmem:[%s1631_s1] sm:$0xff]  ;;  %v399_v39 = vld [vmem:[%s1632_s2 + $0x70] sm:$0xff]  ;;  %v394_v44 = vld [vmem:[%s1632_s2 + $0x48] sm:$0xff] }
  0x20   : > { %317 = vmatpush.msra.mxu1 %v275_v6  ;;  %294 = vmatpush.msra.mxu0 %v274_v24  ;;  %v397_v41 = vld [vmem:[%s1632_s2 + $0x60] sm:$0xff]  ;;  %v395_v43 = vld [vmem:[%s1632_s2 + $0x50] sm:$0xff]  ;;  %v392_v49 = vld [vmem:[%s1632_s2 + $0x38] sm:$0xff] }
  0x21   : > { %402 = vmatpush.msra.mxu2 %v399_v39  ;;  %v393_v47 = vld [vmem:[%s1632_s2 + $0x40] sm:$0xff]  ;;  %v391_v50 = vld [vmem:[%s1632_s2 + $0x30] sm:$0xff]  ;;  %v390_v51 = vld [vmem:[%s1632_s2 + $0x28] sm:$0xff] }
  0x22   : > { %318 = vmatpush.msra.mxu1 %v273_v7  ;;  %295 = vmatpush.msra.mxu0 %v272_v25  ;;  %v389_v54 = vld [vmem:[%s1632_s2 + $0x20] sm:$0xff]  ;;  %v388_v60 = vld [vmem:[%s1632_s2 + $0x18] sm:$0xff]  ;;  %v387_v62 = vld [vmem:[%s1632_s2 + $0x10] sm:$0xff] }
  0x23   : > { %403 = vmatpush.msra.mxu2 %v398_v40  ;;  %v386_v63 = vld [vmem:[%s1632_s2 + $0x8] sm:$0xff]  ;;  %v385_v0 = vld [vmem:[%s1632_s2] sm:$0xff]  ;;  %v476_v5 = vld [vmem:[%s1633_s3 + $0x78] sm:$0xff] }
  0x24   : > { %319 = vmatpush.msra.mxu1 %v271_v8  ;;  %296 = vmatpush.msra.mxu0 %v270_v26  ;;  %v1316_v4 = vld [vmem:[%s1635_s5] sm:$0xf]  ;;  %v475_v6 = vld [vmem:[%s1633_s3 + $0x70] sm:$0xff]  ;;  %v474_v7 = vld [vmem:[%s1633_s3 + $0x68] sm:$0xff] }
  0x25   : > { %404 = vmatpush.msra.mxu2 %v397_v41  ;;  %481 = vmatpush.msra.mxu3 %v476_v5  ;;  %v469_v18 = vld [vmem:[%s1633_s3 + $0x40] sm:$0xff]  ;;  %v468_v20 = vld [vmem:[%s1633_s3 + $0x38] sm:$0xff]  ;;  %v467_v24 = vld [vmem:[%s1633_s3 + $0x30] sm:$0xff] }
  0x26   : > { %320 = vmatpush.msra.mxu1 %v269_v9  ;;  %297 = vmatpush.msra.mxu0 %v268_v27  ;;  %v473_v9 = vld [vmem:[%s1633_s3 + $0x60] sm:$0xff]  ;;  %v466_v26 = vld [vmem:[%s1633_s3 + $0x28] sm:$0xff]  ;;  %v859_v5 = vld [vmem:[%s1631_s1 + $0x150] sm:$0xff] }
  0x27   : > { %405 = vmatpush.msra.mxu2 %v396_v42  ;;  %482 = vmatpush.msra.mxu3 %v475_v6  ;;  %v465_v42 = vld [vmem:[%s1633_s3 + $0x20] sm:$0xff]  ;;  %v860_v6 = vld [vmem:[%s1631_s1 + $0x158] sm:$0xff] }
  0x28   : > { %321 = vmatpush.msra.mxu1 %v267_v10  ;;  %298 = vmatpush.msra.mxu0 %v266_v28  ;;  %v472_v10 = vld [vmem:[%s1633_s3 + $0x58] sm:$0xff] }
  0x29   : > { %406 = vmatpush.msra.mxu2 %v395_v43  ;;  %483 = vmatpush.msra.mxu3 %v474_v7  ;;  %v464_v43 = vld [vmem:[%s1633_s3 + $0x18] sm:$0xff] }
  0x2a   : > { %322 = vmatpush.msra.mxu1 %v265_v11  ;;  %299 = vmatpush.msra.mxu0 %v264_v29  ;;  %v471_v11 = vld [vmem:[%s1633_s3 + $0x50] sm:$0xff] }
  0x2b   : > { %407 = vmatpush.msra.mxu2 %v394_v44  ;;  %484 = vmatpush.msra.mxu3 %v473_v9  ;;  %v463_v44 = vld [vmem:[%s1633_s3 + $0x10] sm:$0xff]  ;;  %v858_v9 = vld [vmem:[%s1631_s1 + $0x148] sm:$0xff] }
  0x2c   : > { %323 = vmatpush.msra.mxu1 %v263_v12  ;;  %300 = vmatpush.msra.mxu0 %v262_v31  ;;  %v470_v12 = vld [vmem:[%s1633_s3 + $0x48] sm:$0xff] }
  0x2d   : > { %408 = vmatpush.msra.mxu2 %v393_v47  ;;  %485 = vmatpush.msra.mxu3 %v472_v10  ;;  %v879_v47 = vld [vmem:[%s1631_s1 + $0x1f0] sm:$0xff] }
  0x2e   : > { %324 = vmatpush.msra.mxu1 %v261_v13  ;;  %301 = vmatpush.msra.mxu0 %v260_v33 }
  0x2f   : > { %409 = vmatpush.msra.mxu2 %v392_v49  ;;  %486 = vmatpush.msra.mxu3 %v471_v11  ;;  %v877_v49 = vld [vmem:[%s1631_s1 + $0x1e0] sm:$0xff] }
  0x30   : > { %325 = vmatpush.msra.mxu1 %v259_v14  ;;  %302 = vmatpush.msra.mxu0 %v258_v34 }
  0x31   : > { %410 = vmatpush.msra.mxu2 %v391_v50  ;;  %487 = vmatpush.msra.mxu3 %v470_v12  ;;  %v878_v50 = vld [vmem:[%s1631_s1 + $0x1e8] sm:$0xff] }
  0x32   : > { %326 = vmatpush.msra.mxu1 %v257_v15  ;;  %303 = vmatpush.msra.mxu0 %v256_v37 }
  0x33   : > { %327 = vmatmul.f32.vlgmr.msra.gmra.mxu1 %v1199_v16  ;;  %304 = vmatmul.f32.vlgmr.msra.gmra.mxu0 %v1199_v16 }
  0x34   : > { %411 = vmatpush.msra.mxu2 %v390_v51  ;;  %846 = vmatpush.msk.msrb.mxu0 %vm432_vm1, %v1316_v4  ;;  %v875_v51 = vld [vmem:[%s1631_s1 + $0x1d0] sm:$0xff] }
  0x35   : > { %488 = vmatpush.msra.mxu3 %v469_v18  ;;  %v856_v18 = vld [vmem:[%s1631_s1 + $0x138] sm:$0xff] }
  0x36   : > { %412 = vmatpush.msra.mxu2 %v389_v54  ;;  %541 = vmatpush.msra.mxu0 %v879_v47  ;;  %v874_v54 = vld [vmem:[%s1631_s1 + $0x1c8] sm:$0xff]  ;;  %v883_v47 = vld [vmem:[%s1632_s2 + $0x90] sm:$0xff] }
  0x37   : > { %489 = vmatpush.msra.mxu3 %v468_v20  ;;  %v854_v20 = vld [vmem:[%s1631_s1 + $0x128] sm:$0xff] }
  0x38   : > { %413 = vmatpush.msra.mxu2 %v388_v60  ;;  %542 = vmatpush.msra.mxu0 %v877_v49  ;;  %v867_v60 = vld [vmem:[%s1631_s1 + $0x190] sm:$0xff]  ;;  %v881_v49 = vld [vmem:[%s1632_s2 + $0x80] sm:$0xff] }
  0x39   : > { %490 = vmatpush.msra.mxu3 %v467_v24  ;;  %v850_v24 = vld [vmem:[%s1631_s1 + $0x108] sm:$0xff] }
  0x3a   : > { %414 = vmatpush.msra.mxu2 %v387_v62  ;;  %543 = vmatpush.msra.mxu0 %v875_v51  ;;  %v865_v62 = vld [vmem:[%s1631_s1 + $0x180] sm:$0xff] }
  0x3b   : > { %330 = vmatmul.f32.gmra.mxu1 %v1202_v17  ;;  %307 = vmatmul.f32.gmra.mxu0 %v1202_v17 }
  0x3c   : > { %415 = vmatpush.msra.mxu2 %v386_v63  ;;  %491 = vmatpush.msra.mxu3 %v466_v26  ;;  %v866_v63 = vld [vmem:[%s1631_s1 + $0x188] sm:$0xff]  ;;  %v895_v26 = vld [vmem:[%s1632_s2 + $0xf0] sm:$0xff] }
  0x3e   : > { %416 = vmatpush.msra.mxu2 %v385_v0  ;;  %492 = vmatpush.msra.mxu3 %v465_v42  ;;  %v863_v0 = vld [vmem:[%s1631_s1 + $0x170] sm:$0xff] }
  0x40   : > { %493 = vmatpush.msra.mxu3 %v464_v43 }
  0x42   : > { %494 = vmatpush.msra.mxu3 %v463_v44 }
  0xb0   : > { %v328_v30 = vpop.f32.mrf.mxu1  ;;  %v305_v61 = vpop.f32.mrf.mxu0 }
  0xb1   : > { %v335_v32 = vsel %vm334_vm0, %v328_v30, -inf }
  0xb2   : > { %336 = vmax.xlane.f32.xlu0 %v335_v32 }
  0xb8   : > { %v331_v35 = vpop.f32.mrf.mxu1  ;;  %v308_v2 = vpop.f32.mrf.mxu0 }
  0xb9   : > { %v338_v36 = vsel %vm334_vm0, %v331_v35, -inf }
  0xba   : > { %339 = vmax.xlane.f32.xlu0 %v338_v36 }
 0x125   : > { %v337_v45 = vpop.xlane.xlu0 %336 }
 0x126   : > { %v341_v46 = vsub.f32 %v328_v30, %v337_v45  ;;  %v462_v45 = vld [vmem:[%s1633_s3 + $0x8] sm:$0xff] }
 0x127   : > { %495 = vmatpush.msra.mxu3 %v462_v45 }
 0x128   : > { %v343_v48 = vmul.f32 1.442695, %v341_v46  ;;  %v461_v46 = vld [vmem:[%s1633_s3] sm:$0xff] }
 0x129   : > { %496 = vmatpush.msra.mxu3 %v461_v46  ;;  %v884_v46 = vld [vmem:[%s1632_s2 + $0x98] sm:$0xff] }
 0x12a   : > { %966 = vpow2.f32 %v343_v48  ;;  %v880_v48 = vld [vmem:[%s1631_s1 + $0x1f8] sm:$0xff] }
 0x12b   : > { %897 = vmatpush.msk.msrb.mxu3 %vm432_vm1, %v1316_v4  ;;  %564 = vmatpush.msrb.mxu1 %v880_v48  ;;  %v882_v48 = vld [vmem:[%s1632_s2 + $0x88] sm:$0xff] }
 0x12d   : > { %v340_v52 = vpop.xlane.xlu0 %339  ;;  %565 = vmatpush.msrb.mxu1 %v878_v50 }
 0x12e   : > { %v342_v53 = vsub.f32 %v331_v35, %v340_v52  ;;  %v876_v52 = vld [vmem:[%s1631_s1 + $0x1d8] sm:$0xff] }
 0x12f   : > { %566 = vmatpush.msrb.mxu1 %v876_v52 }
 0x130   : > { %v1293_v55 = vpop.eup %966  ;;  %v345_v56 = vmul.f32 1.442695, %v342_v53  ;;  %v873_v53 = vld [vmem:[%s1631_s1 + $0x1c0] sm:$0xff] }
 0x131   : > { %v347_v57 = vsel %vm334_vm0, %v1293_v55, 0.0  ;;  %544 = vmatpush.msra.mxu0 %v873_v53  ;;  %567 = vmatpush.msrb.mxu1 %v874_v54 }
 0x132   : > { %968 = vpow2.f32 %v345_v56  ;;  %348 = vadd.xlane.f32.xlu1 %v347_v57  ;;  %v872_v56 = vld [vmem:[%s1631_s1 + $0x1b8] sm:$0xff] }
 0x133   : > { %970 = vtanh.f32 %v305_v61  ;;  %568 = vmatpush.msrb.mxu1 %v872_v56  ;;  %v868_v61 = vld [vmem:[%s1631_s1 + $0x198] sm:$0xff] }
 0x134   : > { %972 = vtanh.f32 %v308_v2  ;;  %v861_v2 = vld [vmem:[%s1631_s1 + $0x160] sm:$0xff] }
 0x138   : > { %v1297_v58 = vpop.eup %968 }
 0x139   : > { %v350_v59 = vsel %vm334_vm0, %v1297_v58, 0.0  ;;  %v971_v1 = vpop.eup %970 }
 0x13a   : > { %351 = vadd.xlane.f32.xlu1 %v350_v59  ;;  %417 = vmatmul.f32.vlgmr.msra.gmra.mxu2 %v971_v1  ;;  %v973_v3 = vpop.eup %972  ;;  %v870_v59 = vld [vmem:[%s1631_s1 + $0x1a8] sm:$0xff]  ;;  %v864_v1 = vld [vmem:[%s1631_s1 + $0x178] sm:$0xff] }
 0x13b   : > { %569 = vmatpush.msrb.mxu1 %v870_v59 }
 0x13d   : > { %570 = vmatpush.msrb.mxu1 %v868_v61 }
 0x13f   : > { %571 = vmatpush.msrb.mxu1 %v866_v63 }
 0x141   : > { %572 = vmatpush.msrb.mxu1 %v864_v1 }
 0x142   : > { %420 = vmatmul.f32.gmra.mxu2 %v973_v3  ;;  %v862_v3 = vld [vmem:[%s1631_s1 + $0x168] sm:$0xff] }
 0x143   : > { %573 = vmatpush.msrb.mxu1 %v862_v3 }
 0x145   : > { %574 = vmatpush.msrb.mxu1 %v860_v6  ;;  %v913_v6 = vld [vmem:[%s1633_s3 + $0xe8] sm:$0xff] }
 0x147   : > { %575 = vmatpush.msrb.mxu1 %v858_v9  ;;  %v911_v9 = vld [vmem:[%s1633_s3 + $0xd8] sm:$0xff] }
 0x149   : > { %576 = vmatpush.msrb.mxu1 %v856_v18 }
 0x14b   : > { %577 = vmatpush.msrb.mxu1 %v854_v20 }
 0x1a5   : > { %v349_v8 = vpop.xlane.xlu1 %348 }
 0x1a6   : > { %974 = vrcp.f32 %v349_v8  ;;  %v364_v21 = vand.u32 2147483648, %v349_v8  ;;  %v362_v23 = vand.u32 2147483647, %v349_v8  ;;  %vm358_vm3 = vweird.f32 %v349_v8 }
 0x1a8   : > { %v365_v28 = vor.u32 1.1754944e-38, %v364_v21  ;;  %vm363_vm5 = vcmp.eq.f32.partialorder %v362_v23, 8.507059e+37  ;;  %v851_v21 = vld [vmem:[%s1631_s1 + $0x110] sm:$0xff]  ;;  %v849_v23 = vld [vmem:[%s1631_s1 + $0x100] sm:$0xff] }
 0x1ac   : > { %v975_v13 = vpop.eup %974 }
 0x1ad   : > { %v354_v14 = vmul.f32 %v975_v13, %v349_v8  ;;  %v352_v15 = vpop.xlane.xlu1 %351  ;;  %vm359_vm2 = vweird.f32 %v975_v13  ;;  %v857_v8 = vld [vmem:[%s1631_s1 + $0x140] sm:$0xff] }
 0x1ae   : > { %976 = vrcp.f32 %v352_v15  ;;  %vm360_vm4 = vmor %vm358_vm3, %vm359_vm2  ;;  %v379_v34 = vand.u32 2147483648, %v352_v15  ;;  %v377_v36 = vand.u32 2147483647, %v352_v15  ;;  %vm373_vm7 = vweird.f32 %v352_v15 }
 0x1af   : > { %v355_v19 = vsub.f32 1.0, %v354_v14 }
 0x1b0   : > { %v380_v38 = vor.u32 1.1754944e-38, %v379_v34  ;;  %vm378_vm9 = vcmp.eq.f32.partialorder %v377_v36, 8.507059e+37  ;;  %v888_v34 = vld [vmem:[%s1632_s2 + $0xb8] sm:$0xff] }
 0x1b1   : > { %v356_v22 = vmul.f32 %v975_v13, %v355_v19  ;;  %v853_v19 = vld [vmem:[%s1631_s1 + $0x120] sm:$0xff] }
 0x1b3   : > { %v357_v25 = vadd.f32 %v975_v13, %v356_v22  ;;  %v852_v22 = vld [vmem:[%s1631_s1 + $0x118] sm:$0xff] }
 0x1b4   : > { %v977_v27 = vpop.eup %976  ;;  %578 = vmatpush.msrb.mxu1 %v852_v22 }
 0x1b5   : > { %v369_v29 = vmul.f32 %v977_v27, %v352_v15  ;;  %v361_v30 = vsel %vm360_vm4, %v975_v13, %v357_v25  ;;  %vm374_vm6 = vweird.f32 %v977_v27  ;;  %v855_v15 = vld [vmem:[%s1631_s1 + $0x130] sm:$0xff]  ;;  %v896_v25 = vld [vmem:[%s1632_s2 + $0xf8] sm:$0xff] }
 0x1b6   : > { %v366_v31 = vsel %vm363_vm5, %v365_v28, %v361_v30  ;;  %vm375_vm8 = vmor %vm373_vm7, %vm374_vm6  ;;  %579 = vmatpush.msrb.mxu1 %v850_v24  ;;  %654 = vmatpush.msrb.mxu2 %v896_v25  ;;  %v893_v28 = vld [vmem:[%s1632_s2 + $0xe0] sm:$0xff]  ;;  %v891_v30 = vld [vmem:[%s1632_s2 + $0xd0] sm:$0xff] }
 0x1b7   : > { %v370_v32 = vsub.f32 1.0, %v369_v29  ;;  %v367_v33 = vmul.f32 %v1293_v55, %v366_v31  ;;  %v871_v55 = vld [vmem:[%s1631_s1 + $0x1b0] sm:$0xff]  ;;  %v892_v29 = vld [vmem:[%s1632_s2 + $0xd8] sm:$0xff]  ;;  %v890_v31 = vld [vmem:[%s1632_s2 + $0xc8] sm:$0xff] }
 0x1b8   : > { %545 = vmatpush.msra.mxu0 %v871_v55  ;;  %655 = vmatpush.msrb.mxu2 %v895_v26  ;;  %v905_v25 = vld [vmem:[%s1633_s3 + $0xa8] sm:$0xff] }
 0x1b9   : > { %v371_v35 = vmul.f32 %v977_v27, %v370_v32  ;;  %847 = vmatmul.msk.f32.vlgmr.msrb.gmra.mxu0 %vm334_vm0, %v367_v33  ;;  %v889_v32 = vld [vmem:[%s1632_s2 + $0xc0] sm:$0xff] }
 0x1ba   : > { %v964_v33 = vld [vmem:[%s1634_s4] ss:$0 sm:$0xff] }
 0x1bb   : > { %v372_v37 = vadd.f32 %v977_v27, %v371_v35  ;;  %v887_v35 = vld [vmem:[%s1632_s2 + $0xb0] sm:$0xff] }
 0x1bd   : > { %v376_v39 = vsel %vm375_vm8, %v977_v27, %v372_v37  ;;  %v418_v57 = vpop.f32.mrf.mxu2  ;;  %v894_v27 = vld [vmem:[%s1632_s2 + $0xe8] sm:$0xff] }
 0x1be   : > { %v381_v40 = vsel %vm378_vm9, %v380_v38, %v376_v39  ;;  %978 = vtanh.f32 %v418_v57  ;;  %656 = vmatpush.msrb.mxu2 %v894_v27  ;;  %v886_v38 = vld [vmem:[%s1632_s2 + $0xa8] sm:$0xff] }
 0x1bf   : > { %v382_v41 = vmul.f32 %v1297_v58, %v381_v40  ;;  %v869_v58 = vld [vmem:[%s1631_s1 + $0x1a0] sm:$0xff] }
 0x1c0   : > { %546 = vmatpush.msra.mxu0 %v869_v58  ;;  %657 = vmatpush.msrb.mxu2 %v893_v28  ;;  %v885_v40 = vld [vmem:[%s1632_s2 + $0xa0] sm:$0xff] }
 0x1c1   : > { %848 = vmatmul.msk.f32.gmra.mxu0 %vm334_vm0, %v382_v41 }
 0x1c2   : > { %547 = vmatpush.msra.mxu0 %v867_v60  ;;  %658 = vmatpush.msrb.mxu2 %v892_v29 }
 0x1c4   : > { %548 = vmatpush.msra.mxu0 %v865_v62  ;;  %v979_v7 = vpop.eup %978  ;;  %659 = vmatpush.msrb.mxu2 %v891_v30  ;;  %v904_v30 = vld [vmem:[%s1633_s3 + $0xa0] sm:$0xff] }
 0x1c5   : > { %v421_v4 = vpop.f32.mrf.mxu2 }
 0x1c6   : > { %549 = vmatpush.msra.mxu0 %v863_v0  ;;  %980 = vtanh.f32 %v421_v4  ;;  %660 = vmatpush.msrb.mxu2 %v890_v31  ;;  %v915_v4 = vld [vmem:[%s1633_s3 + $0xf8] sm:$0xff] }
 0x1c8   : > { %550 = vmatpush.msra.mxu0 %v861_v2  ;;  %661 = vmatpush.msrb.mxu2 %v889_v32 }
 0x1ca   : > { %551 = vmatpush.msra.mxu0 %v859_v5  ;;  %662 = vmatpush.msrb.mxu2 %v888_v34  ;;  %v914_v5 = vld [vmem:[%s1633_s3 + $0xf0] sm:$0xff]  ;;  %v903_v34 = vld [vmem:[%s1633_s3 + $0x98] sm:$0xff] }
 0x1cc   : > { %552 = vmatpush.msra.mxu0 %v857_v8  ;;  %v981_v12 = vpop.eup %980  ;;  %663 = vmatpush.msrb.mxu2 %v887_v35  ;;  %v912_v8 = vld [vmem:[%s1633_s3 + $0xe0] sm:$0xff] }
 0x1ce   : > { %553 = vmatpush.msra.mxu0 %v855_v15  ;;  %664 = vmatpush.msrb.mxu2 %v886_v38  ;;  %v908_v15 = vld [vmem:[%s1633_s3 + $0xc0] sm:$0xff]  ;;  %v902_v38 = vld [vmem:[%s1633_s3 + $0x90] sm:$0xff] }
 0x1d0   : > { %554 = vmatpush.msra.mxu0 %v853_v19  ;;  %665 = vmatpush.msrb.mxu2 %v885_v40  ;;  %v907_v19 = vld [vmem:[%s1633_s3 + $0xb8] sm:$0xff] }
 0x1d2   : > { %555 = vmatpush.msra.mxu0 %v851_v21  ;;  %666 = vmatpush.msrb.mxu2 %v884_v46  ;;  %v901_v46 = vld [vmem:[%s1633_s3 + $0x88] sm:$0xff] }
 0x1d4   : > { %556 = vmatpush.msra.mxu0 %v849_v23  ;;  %667 = vmatpush.msrb.mxu2 %v883_v47  ;;  %v906_v23 = vld [vmem:[%s1633_s3 + $0xb0] sm:$0xff]  ;;  %v900_v47 = vld [vmem:[%s1633_s3 + $0x80] sm:$0xff] }
 0x1d6   : > { %668 = vmatpush.msrb.mxu2 %v882_v48 }
 0x1d8   : > { %669 = vmatpush.msrb.mxu2 %v881_v49 }
 0x236   : > { %v453_v10 = vpop.f32.mrf.mxu0 }
 0x237   : > { %v459_v11 = vmul.f32 %v979_v7, %v453_v10  ;;  %v910_v10 = vld [vmem:[%s1633_s3 + $0xd0] sm:$0xff] }
 0x239   : > { %497 = vmatmul.f32.vlgmr.msra.gmra.mxu3 %v459_v11  ;;  %v909_v11 = vld [vmem:[%s1633_s3 + $0xc8] sm:$0xff] }
 0x23a   : > { %732 = vmatpush.msra.mxu3 %v915_v4 }
 0x23c   : > { %733 = vmatpush.msra.mxu3 %v914_v5 }
 0x23e   : > { %v456_v13 = vpop.f32.mrf.mxu0  ;;  %734 = vmatpush.msra.mxu3 %v913_v6 }
 0x23f   : > { %v460_v14 = vmul.f32 %v981_v12, %v456_v13 }
 0x240   : > { %735 = vmatpush.msra.mxu3 %v912_v8 }
 0x241   : > { %500 = vmatmul.f32.gmra.mxu3 %v460_v14 }
 0x242   : > { %736 = vmatpush.msra.mxu3 %v911_v9 }
 0x244   : > { %737 = vmatpush.msra.mxu3 %v910_v10 }
 0x246   : > { %738 = vmatpush.msra.mxu3 %v909_v11 }
 0x248   : > { %739 = vmatpush.msra.mxu3 %v908_v15 }
 0x24a   : > { %740 = vmatpush.msra.mxu3 %v907_v19 }
 0x24c   : > { %741 = vmatpush.msra.mxu3 %v906_v23 }
 0x24e   : > { %742 = vmatpush.msra.mxu3 %v905_v25 }
 0x250   : > { %743 = vmatpush.msra.mxu3 %v904_v30 }
 0x252   : > { %744 = vmatpush.msra.mxu3 %v903_v34 }
 0x254   : > { %745 = vmatpush.msra.mxu3 %v902_v38 }
 0x256   : > { %746 = vmatpush.msra.mxu3 %v901_v46 }
 0x258   : > { %747 = vmatpush.msra.mxu3 %v900_v47 }
 0x2bc   : > { %v498_v36 = vpop.f32.mrf.mxu3 }
 0x2bd   : > { %v499_v37 = vadd.f32 %v964_v33, %v498_v36 }
 0x2bf   : > { %v504_v39 = vmul.f32 %v499_v37, %v1199_v16 }
 0x2c1   : > { %v1511_v41 = vadd.f32 %v504_v39, %v1199_v16 }
 0x2c3   : > { %557 = vmatmul.f32.vlgmr.msra.gmra.mxu0 %v1511_v41  ;;  %580 = vmatmul.f32.vlgmr.msrb.gmra.mxu1 %v1511_v41 }
 0x2c4   : > { %v501_v42 = vpop.f32.mrf.mxu3 }
 0x2c5   : > { %v502_v43 = vadd.f32 %v964_v33, %v501_v42 }
 0x2c7   : > { %v505_v44 = vmul.f32 %v502_v43, %v1202_v17 }
 0x2c9   : > { %v1517_v45 = vadd.f32 %v505_v44, %v1202_v17 }
 0x2cb   : > { %560 = vmatmul.f32.gmra.mxu0 %v1517_v45  ;;  %583 = vmatmul.f32.gmra.mxu1 %v1517_v45 }
 0x340   : > { %v558_v50 = vpop.f32.mrf.mxu0  ;;  %v581_v51 = vpop.f32.mrf.mxu1 }
 0x341   : > { %982 = vtanh.f32 %v558_v50  ;;  %v587_v52 = vsel %vm334_vm0, %v581_v51, -inf }
 0x342   : > { %588 = vmax.xlane.f32.xlu2 %v587_v52 }
 0x347   : > { %v983_v53 = vpop.eup %982 }
 0x348   : > { %v561_v54 = vpop.f32.mrf.mxu0  ;;  %v584_v55 = vpop.f32.mrf.mxu1  ;;  %670 = vmatmul.f32.vlgmr.msrb.gmra.mxu2 %v983_v53 }
 0x349   : > { %984 = vtanh.f32 %v561_v54  ;;  %v590_v56 = vsel %vm334_vm0, %v584_v55, -inf }
 0x34a   : > { %591 = vmax.xlane.f32.xlu2 %v590_v56  ;;  %v965_v56 = vld [vmem:[%s1634_s4 + $0x1] ss:$0 sm:$0xff] }
 0x34f   : > { %v985_v57 = vpop.eup %984 }
 0x350   : > { %673 = vmatmul.f32.gmra.mxu2 %v985_v57 }
 0x3b5   : > { %v589_v58 = vpop.xlane.xlu2 %588 }
 0x3b6   : > { %v593_v59 = vsub.f32 %v581_v51, %v589_v58 }
 0x3b8   : > { %v595_v60 = vmul.f32 1.442695, %v593_v59 }
 0x3ba   : > { %986 = vpow2.f32 %v595_v60 }
 0x3bd   : > { %v592_v61 = vpop.xlane.xlu2 %591 }
 0x3be   : > { %v594_v62 = vsub.f32 %v584_v55, %v592_v61 }
 0x3c0   : > { %v987_v63 = vpop.eup %986  ;;  %v597_v0 = vmul.f32 1.442695, %v594_v62 }
 0x3c1   : > { %v599_v1 = vsel %vm334_vm0, %v987_v63, 0.0 }
 0x3c2   : > { %988 = vpow2.f32 %v597_v0  ;;  %600 = vadd.xlane.f32.xlu0 %v599_v1 }
 0x3c8   : > { %v1536_v2 = vpop.eup %988 }
 0x3c9   : > { %v602_v3 = vsel %vm334_vm0, %v1536_v2, 0.0 }
 0x3ca   : > { %603 = vadd.xlane.f32.xlu1 %v602_v3 }
 0x3cb   : > { %v671_v48 = vpop.f32.mrf.mxu2 }
 0x3d3   : > { %v674_v49 = vpop.f32.mrf.mxu2 }
 0x435   : > { %v601_v7 = vpop.xlane.xlu0 %600 }
 0x436   : > { %990 = vrcp.f32 %v601_v7  ;;  %v616_v20 = vand.u32 2147483648, %v601_v7  ;;  %v614_v22 = vand.u32 2147483647, %v601_v7  ;;  %vm610_vm11 = vweird.f32 %v601_v7 }
 0x438   : > { %v617_v27 = vor.u32 1.1754944e-38, %v616_v20  ;;  %vm615_vm13 = vcmp.eq.f32.partialorder %v614_v22, 8.507059e+37 }
 0x43c   : > { %v991_v12 = vpop.eup %990 }
 0x43d   : > { %v606_v13 = vmul.f32 %v991_v12, %v601_v7  ;;  %v604_v14 = vpop.xlane.xlu1 %603  ;;  %vm611_vm10 = vweird.f32 %v991_v12 }
 0x43e   : > { %992 = vrcp.f32 %v604_v14  ;;  %vm612_vm12 = vmor %vm610_vm11, %vm611_vm10  ;;  %v631_v35 = vand.u32 2147483648, %v604_v14  ;;  %v629_v37 = vand.u32 2147483647, %v604_v14  ;;  %vm625_vm15 = vweird.f32 %v604_v14 }
 0x43f   : > { %v607_v18 = vsub.f32 1.0, %v606_v13  ;;  %994 = vtanh.f32 %v671_v48 }
 0x440   : > { %v632_v40 = vor.u32 1.1754944e-38, %v631_v35  ;;  %vm630_vm2 = vcmp.eq.f32.partialorder %v629_v37, 8.507059e+37  ;;  %996 = vtanh.f32 %v674_v49 }
 0x441   : > { %v608_v21 = vmul.f32 %v991_v12, %v607_v18 }
 0x443   : > { %v609_v24 = vadd.f32 %v991_v12, %v608_v21 }
 0x444   : > { %v993_v26 = vpop.eup %992 }
 0x445   : > { %v613_v28 = vsel %vm612_vm12, %v991_v12, %v609_v24  ;;  %v621_v29 = vmul.f32 %v993_v26, %v604_v14  ;;  %vm626_vm14 = vweird.f32 %v993_v26  ;;  %v995_v50 = vpop.eup %994 }
 0x446   : > { %v618_v31 = vsel %vm615_vm13, %v617_v27, %v613_v28  ;;  %vm627_vm1 = vmor %vm625_vm15, %vm626_vm14  ;;  %v997_v53 = vpop.eup %996 }
 0x447   : > { %v622_v32 = vsub.f32 1.0, %v621_v29  ;;  %v619_v33 = vmul.f32 %v987_v63, %v618_v31 }
 0x449   : > { %v623_v36 = vmul.f32 %v993_v26, %v622_v32  ;;  %898 = vmatmul.msk.f32.vlgmr.msrb.gmra.mxu3 %vm334_vm0, %v619_v33 }
 0x44b   : > { %v624_v39 = vadd.f32 %v993_v26, %v623_v36 }
 0x44d   : > { %v628_v42 = vsel %vm627_vm1, %v993_v26, %v624_v39 }
 0x44e   : > { %v633_v43 = vsel %vm630_vm2, %v632_v40, %v628_v42 }
 0x44f   : > { %v634_v44 = vmul.f32 %v1536_v2, %v633_v43 }
 0x451   : > { %899 = vmatmul.msk.f32.gmra.mxu3 %vm334_vm0, %v634_v44 }
 0x4cc   : > { %v702_v51 = vpop.f32.mrf.mxu3 }
 0x4cd   : > { %v708_v52 = vmul.f32 %v995_v50, %v702_v51 }
 0x4cf   : > { %748 = vmatmul.f32.vlgmr.msra.gmra.mxu3 %v708_v52 }
 0x4d4   : > { %v705_v54 = vpop.f32.mrf.mxu3 }
 0x4d5   : > { %v709_v55 = vmul.f32 %v997_v53, %v705_v54 }
 0x4d7   : > { %751 = vmatmul.f32.gmra.mxu3 %v709_v55 }
 0x552   : > { %v749_v57 = vpop.f32.mrf.mxu3 }
 0x553   : > { %v750_v58 = vadd.f32 %v965_v56, %v749_v57 }
 0x555   : > { %v755_v59 = vmul.f32 %v750_v58, %v1199_v16 }
 0x557   : > { %v757_v60 = vadd.f32 %v755_v59, %v1511_v41 }
 0x559   : > { %759 = vst [vmem:[%s245_s13] sm:$0xff] %v757_v60 }
 0x55a   : > { %v752_v61 = vpop.f32.mrf.mxu3 }
 0x55b   : > { %v753_v62 = vadd.f32 %v965_v56, %v752_v61 }
 0x55d   : > { %v756_v63 = vmul.f32 %v753_v62, %v1202_v17 }
 0x55f   : > { %v758_v16 = vadd.f32 %v756_v63, %v1517_v45 }
 0x561   : > { %760 = vst [vmem:[%s245_s13 + $0x8] sm:$0xff] %v758_v16 }
 0x562   : > { %1025 = shalt.err (!%p1022_p3)
}
 0x563   : > { %s1062_s26 = smov 128   ;;  %s1063_s29 = smov 8  }
 0x564   : > { %923 = dma.vmem_to_hbm [thread:$0]  (%p1137_p5), %s775_s14, 256, %s777_s15, %s762_s25, %s1062_s26, %s1062_s26, %s1063_s29  }
 0x565 PF: > { %p929_p4 = scmp.ge.s32.totalorder %s1060_s24, 2  ;;  %s791_s9 = sand.u32 1, %s1048_s21  }
 0x566   : > { %s792_s11 = scalar_lea.sflag [#allocation3], %s791_s9 }
 0x567   : > { %p926_p7 = pnand %p929_p4, %p1141_p6 }
 0x569   : > { %p927_p8 = pneg %p926_p7 }
 0x56b   : > { %1043 = dma.done.wait (%p927_p8), %s792_s11, 256  }
 0x56c   : > { %1045 = vsyncadd (%p927_p8), %s792_s11, 4294967040  ;;  %p16_p9 = scmp.ge.s32.totalorder %s1124_s27, 4   ;;  %s1639_s21 = smov %s1052_s22 }
 0x56d   : > { %s1640_s22 = smov %s1056_s23  ;;  %s1641_s23 = smov %s1135_s30 }
 0x56e   : > { %s1642_s24 = smov %s1124_s27  ;;  %18 = sbr.rel (!%p16_p9) target bundleno = 3 (0x3), region = 83 }
 0x573   :  { %798 = vsyncpa [#allocation3], 1 }
 0x574   :  { %800 = vsyncpa [#allocation3 + $0x1], 1 }

// kernel: tpu_custom_call.1
= control target key start
LH: loop header
LB: loop body
LE: loop exit
PB: predicated region body
PF: predicated region fallthrough
CT: control target
= control target key end

     0   :  { %11 = vsyncpa [#allocation3], 0  ;;  %s1630_s0 = inlined_call_operand.vmem [shape: f32[32,128], index: 0, kind: input, shape index: {}]   ;;  %s1631_s1 = inlined_call_operand.vmem [shape: f32[2,128,132], index: 1, kind: input, shape index: {}]   ;;  %s1632_s2 = inlined_call_operand.vmem [shape: f32[2,128,128], index: 2, kind: input, shape index: {}]   ;;  %s1633_s3 = inlined_call_operand.vmem [shape: f32[2,128,128], index: 3, kind: input, shape index: {}]   ;;  %s1634_s4 = inlined_call_operand.vmem [shape: f32[2,1,128], index: 4, kind: input, shape index: {}]   ;;  %s1635_s5 = inlined_call_operand.vmem [shape: f32[4,128], index: 5, kind: input, shape index: {}]   ;;  %s1636_s6 = inlined_call_operand.hbm [shape: f32[32,128], index: 6, kind: output, shape index: {}]  }
   0x1   :  { %13 = vsyncpa [#allocation3 + $0x1], 0  ;;  %s1099_s21 = smov 0   ;;  %s1101_s22 = smov 0  }
   0x2   :  { %s1103_s23 = smov 0   ;;  %s1105_s24 = smov 0  }
   0x3 LB: > { %s1120_s25 = sadd.s32 4294967295, %s1060_s24   ;;  %s839_s26 = sadd.s32 4294967294, %s1060_s24   ;;  %s1060_s24 = sphi %s1105_s24, %s1642_s24   ;;  %s1056_s23 = sphi %s1103_s23, %s1641_s23   ;;  %s1052_s22 = sphi %s1101_s22, %s1640_s22   ;;  %s1048_s21 = sphi %s1099_s21, %s1639_s21  }
   0x4   : > { %s1124_s27 = sadd.s32 1, %s1060_s24   ;;  %s157_s28 = sadd.s32 1, %s1056_s23 }
   0x5   : > { %s154_s29 = ssub.s32 %s1060_s24, %s1124_s27  ;;  %p167_p0 = scmp.ne.s32.totalorder %s1056_s23, %s1052_s22 }
   0x6   : > { %p155_p1 = scmp.eq.s32.totalorder %s154_s29, 0  ;;  %p168_p2 = scmp.eq.s32.totalorder %s1120_s25, 1 }
   0x7   : > { %p173_p3 = scmp.ne.s32.totalorder %s1052_s22, %s1048_s21  ;;  %p174_p4 = scmp.eq.s32.totalorder %s839_s26, 1 }
   0x8   : > { %s1135_s30 = scalar_select %p155_p1, %s1056_s23, %s157_s28  }
   0x9   : > { %p1137_p5 = por %p168_p2, %p167_p0  ;;  %p1141_p6 = por %p174_p4, %p173_p3 }
   0xa   : > { %p842_p7 = scmp.ge.s32.totalorder %s1060_s24, 1  ;;  %p216_p8 = scmp.lt.s32.totalorder %s1060_s24, 3 }
   0xc   : > { %p217_p9 = pnand %p842_p7, %p216_p8 }
   0xd   : > { %s844_s10 = sshll.u32 (!%p217_p9), %s1120_s25, 1  ;;  %s922_s29 = sshll.u32 (!%p217_p9), %s1120_s25, 4 }
   0xe   : > { %220 = sbr.rel (%p217_p9) target bundleno = 1381 (0x565), region = 44  ;;  %p247_p10 = scmp.lt.s32.totalorder (!%p217_p9), %s844_s10, 3 }
   0xf   : > { %s773_s12 = scalar_lea.hbm (!%p217_p9), %s1636_s6, %s922_s29  ;;  %s1018_s19 = scalar_lea.hbm (!%p217_p9), %s1636_s6, 32 }
  0x10   : > { %s776_s15 = sshll.u32 (!%p217_p9), %s773_s12, 4  ;;  %s777_s15 = int_to_ptr.hbm [resolvable:$true] %s776_s15 }
  0x11   : > { %s1012_s16 = sshra.s32 (!%p217_p9), %s777_s15, 4  ;;  %s1013_s16 = int_to_ptr.hbm [resolvable:$true] %s1012_s16 }
  0x12   : > { %p1019_p0 = scmp.lt.s32.totalorder (!%p217_p9), %s1013_s16, %s1636_s6 }
  0x13   : > { %v287_v0 = vld [vmem:[%s1631_s1 + $0xf8] sm:$0xff]  ;;  %v285_v1 = vld [vmem:[%s1631_s1 + $0xe8] sm:$0xff]  ;;  %s1644_s10 = smov (!%p247_p10, %s844_s10), 3  ;;  %v286_v18 = vld [vmem:[%s1631_s1 + $0xf0] sm:$0xff]  ;;  %vm334_vm0 = vcmask 31744   ;;  %vm432_vm1 = vcmask 1043456  }
  0x14   : > { %311 = vmatpush.msra.mxu1 %v287_v0  ;;  %v283_v2 = vld [vmem:[%s1631_s1 + $0xd8] sm:$0xff]  ;;  %v281_v3 = vld [vmem:[%s1631_s1 + $0xc8] sm:$0xff]  ;;  %s845_s26 = sshll.u32 %s1644_s10, 3  ;;  %v284_v19 = vld [vmem:[%s1631_s1 + $0xe0] sm:$0xff]  ;;  %288 = vmatpush.msra.mxu0 %v286_v18  ;;  %s1014_s10 = scalar_lea.hbm %s1013_s16, 16 }
  0x15   : > { %v279_v4 = vld [vmem:[%s1631_s1 + $0xb8] sm:$0xff]  ;;  %v277_v5 = vld [vmem:[%s1631_s1 + $0xa8] sm:$0xff]  ;;  %s250_s14 = scalar_lea.vmem %s1630_s0, %s845_s26  ;;  %v282_v20 = vld [vmem:[%s1631_s1 + $0xd0] sm:$0xff]  ;;  %s243_s26 = sand.u32 1, %s1052_s22  }
  0x16   : > { %312 = vmatpush.msra.mxu1 %v285_v1  ;;  %v275_v6 = vld [vmem:[%s1631_s1 + $0x98] sm:$0xff]  ;;  %v273_v7 = vld [vmem:[%s1631_s1 + $0x88] sm:$0xff]  ;;  %v1199_v16 = vld [vmem:[%s250_s14] sm:$0xff]  ;;  %289 = vmatpush.msra.mxu0 %v284_v19  ;;  %s843_s28 = sshll.u32 %s243_s26, 4  ;;  %s762_s25 = scalar_lea.sflag [#allocation3], %s243_s26 }
  0x17   : > { %v271_v8 = vld [vmem:[%s1631_s1 + $0x78] sm:$0xff]  ;;  %v269_v9 = vld [vmem:[%s1631_s1 + $0x68] sm:$0xff]  ;;  %v280_v21 = vld [vmem:[%s1631_s1 + $0xc0] sm:$0xff]  ;;  %s245_s13 = scalar_lea.vmem [#allocation2], %s843_s28  ;;  %p1015_p11 = scmp.ne.s32.totalorder %s1013_s16, %s1014_s10 }
  0x18   : > { %313 = vmatpush.msra.mxu1 %v283_v2  ;;  %v267_v10 = vld [vmem:[%s1631_s1 + $0x58] sm:$0xff]  ;;  %v265_v11 = vld [vmem:[%s1631_s1 + $0x48] sm:$0xff]  ;;  %290 = vmatpush.msra.mxu0 %v282_v20  ;;  %v278_v22 = vld [vmem:[%s1631_s1 + $0xb0] sm:$0xff]  ;;  %p1020_p1 = scmp.lt.s32.totalorder %s1018_s19, %s1014_s10 }
  0x19   : > { %v263_v12 = vld [vmem:[%s1631_s1 + $0x38] sm:$0xff]  ;;  %v261_v13 = vld [vmem:[%s1631_s1 + $0x28] sm:$0xff]  ;;  %v276_v23 = vld [vmem:[%s1631_s1 + $0xa0] sm:$0xff]  ;;  %p1016_p12 = pnand %p1015_p11, %p1137_p5 }
  0x1a   : > { %314 = vmatpush.msra.mxu1 %v281_v3  ;;  %v259_v14 = vld [vmem:[%s1631_s1 + $0x18] sm:$0xff]  ;;  %v257_v15 = vld [vmem:[%s1631_s1 + $0x8] sm:$0xff]  ;;  %291 = vmatpush.msra.mxu0 %v280_v21  ;;  %v274_v24 = vld [vmem:[%s1631_s1 + $0x90] sm:$0xff]  ;;  %p1021_p2 = por %p1020_p1, %p1019_p0 }
  0x1b   : > { %v1202_v17 = vld [vmem:[%s250_s14 + $0x8] sm:$0xff]  ;;  %v272_v25 = vld [vmem:[%s1631_s1 + $0x80] sm:$0xff]  ;;  %v270_v26 = vld [vmem:[%s1631_s1 + $0x70] sm:$0xff]  ;;  %s774_s14 = sshll.u32 %s245_s13, 4  ;;  %p1017_p13 = pneg %p1016_p12  ;;  %s775_s14 = int_to_ptr.vmem [resolvable:$true] %s774_s14 }
  0x1c   : > { %315 = vmatpush.msra.mxu1 %v279_v4  ;;  %292 = vmatpush.msra.mxu0 %v278_v22  ;;  %v268_v27 = vld [vmem:[%s1631_s1 + $0x60] sm:$0xff]  ;;  %v266_v28 = vld [vmem:[%s1631_s1 + $0x50] sm:$0xff]  ;;  %v400_v38 = vld [vmem:[%s1632_s2 + $0x78] sm:$0xff] }
  0x1d   : > { %v264_v29 = vld [vmem:[%s1631_s1 + $0x40] sm:$0xff]  ;;  %v262_v31 = vld [vmem:[%s1631_s1 + $0x30] sm:$0xff]  ;;  %401 = vmatpush.msra.mxu2 %v400_v38  ;;  %v398_v40 = vld [vmem:[%s1632_s2 + $0x68] sm:$0xff]  ;;  %p1022_p3 = pnand %p1021_p2, %p1017_p13 }
  0x1e   : > { %316 = vmatpush.msra.mxu1 %v277_v5  ;;  %293 = vmatpush.msra.mxu0 %v276_v23  ;;  %v260_v33 = vld [vmem:[%s1631_s1 + $0x20] sm:$0xff]  ;;  %v258_v34 = vld [vmem:[%s1631_s1 + $0x10] sm:$0xff]  ;;  %v396_v42 = vld [vmem:[%s1632_s2 + $0x58] sm:$0xff] }
  0x1f   : > { %v256_v37 = vld [vmem:[%s1631_s1] sm:$0xff]  ;;  %v399_v39 = vld [vmem:[%s1632_s2 + $0x70] sm:$0xff]  ;;  %v394_v44 = vld [vmem:[%s1632_s2 + $0x48] sm:$0xff] }
  0x20   : > { %317 = vmatpush.msra.mxu1 %v275_v6  ;;  %294 = vmatpush.msra.mxu0 %v274_v24  ;;  %v397_v41 = vld [vmem:[%s1632_s2 + $0x60] sm:$0xff]  ;;  %v395_v43 = vld [vmem:[%s1632_s2 + $0x50] sm:$0xff]  ;;  %v392_v49 = vld [vmem:[%s1632_s2 + $0x38] sm:$0xff] }
  0x21   : > { %402 = vmatpush.msra.mxu2 %v399_v39  ;;  %v393_v47 = vld [vmem:[%s1632_s2 + $0x40] sm:$0xff]  ;;  %v391_v50 = vld [vmem:[%s1632_s2 + $0x30] sm:$0xff]  ;;  %v390_v51 = vld [vmem:[%s1632_s2 + $0x28] sm:$0xff] }
  0x22   : > { %318 = vmatpush.msra.mxu1 %v273_v7  ;;  %295 = vmatpush.msra.mxu0 %v272_v25  ;;  %v389_v54 = vld [vmem:[%s1632_s2 + $0x20] sm:$0xff]  ;;  %v388_v60 = vld [vmem:[%s1632_s2 + $0x18] sm:$0xff]  ;;  %v387_v62 = vld [vmem:[%s1632_s2 + $0x10] sm:$0xff] }
  0x23   : > { %403 = vmatpush.msra.mxu2 %v398_v40  ;;  %v386_v63 = vld [vmem:[%s1632_s2 + $0x8] sm:$0xff]  ;;  %v385_v0 = vld [vmem:[%s1632_s2] sm:$0xff]  ;;  %v476_v5 = vld [vmem:[%s1633_s3 + $0x78] sm:$0xff] }
  0x24   : > { %319 = vmatpush.msra.mxu1 %v271_v8  ;;  %296 = vmatpush.msra.mxu0 %v270_v26  ;;  %v1316_v4 = vld [vmem:[%s1635_s5] sm:$0xf]  ;;  %v475_v6 = vld [vmem:[%s1633_s3 + $0x70] sm:$0xff]  ;;  %v474_v7 = vld [vmem:[%s1633_s3 + $0x68] sm:$0xff] }
  0x25   : > { %404 = vmatpush.msra.mxu2 %v397_v41  ;;  %481 = vmatpush.msra.mxu3 %v476_v5  ;;  %v469_v18 = vld [vmem:[%s1633_s3 + $0x40] sm:$0xff]  ;;  %v468_v20 = vld [vmem:[%s1633_s3 + $0x38] sm:$0xff]  ;;  %v467_v24 = vld [vmem:[%s1633_s3 + $0x30] sm:$0xff] }
  0x26   : > { %320 = vmatpush.msra.mxu1 %v269_v9  ;;  %297 = vmatpush.msra.mxu0 %v268_v27  ;;  %v473_v9 = vld [vmem:[%s1633_s3 + $0x60] sm:$0xff]  ;;  %v466_v26 = vld [vmem:[%s1633_s3 + $0x28] sm:$0xff]  ;;  %v859_v5 = vld [vmem:[%s1631_s1 + $0x150] sm:$0xff] }
  0x27   : > { %405 = vmatpush.msra.mxu2 %v396_v42  ;;  %482 = vmatpush.msra.mxu3 %v475_v6  ;;  %v465_v42 = vld [vmem:[%s1633_s3 + $0x20] sm:$0xff]  ;;  %v860_v6 = vld [vmem:[%s1631_s1 + $0x158] sm:$0xff] }
  0x28   : > { %321 = vmatpush.msra.mxu1 %v267_v10  ;;  %298 = vmatpush.msra.mxu0 %v266_v28  ;;  %v472_v10 = vld [vmem:[%s1633_s3 + $0x58] sm:$0xff] }
  0x29   : > { %406 = vmatpush.msra.mxu2 %v395_v43  ;;  %483 = vmatpush.msra.mxu3 %v474_v7  ;;  %v464_v43 = vld [vmem:[%s1633_s3 + $0x18] sm:$0xff] }
  0x2a   : > { %322 = vmatpush.msra.mxu1 %v265_v11  ;;  %299 = vmatpush.msra.mxu0 %v264_v29  ;;  %v471_v11 = vld [vmem:[%s1633_s3 + $0x50] sm:$0xff] }
  0x2b   : > { %407 = vmatpush.msra.mxu2 %v394_v44  ;;  %484 = vmatpush.msra.mxu3 %v473_v9  ;;  %v463_v44 = vld [vmem:[%s1633_s3 + $0x10] sm:$0xff]  ;;  %v858_v9 = vld [vmem:[%s1631_s1 + $0x148] sm:$0xff] }
  0x2c   : > { %323 = vmatpush.msra.mxu1 %v263_v12  ;;  %300 = vmatpush.msra.mxu0 %v262_v31  ;;  %v470_v12 = vld [vmem:[%s1633_s3 + $0x48] sm:$0xff] }
  0x2d   : > { %408 = vmatpush.msra.mxu2 %v393_v47  ;;  %485 = vmatpush.msra.mxu3 %v472_v10  ;;  %v879_v47 = vld [vmem:[%s1631_s1 + $0x1f0] sm:$0xff] }
  0x2e   : > { %324 = vmatpush.msra.mxu1 %v261_v13  ;;  %301 = vmatpush.msra.mxu0 %v260_v33 }
  0x2f   : > { %409 = vmatpush.msra.mxu2 %v392_v49  ;;  %486 = vmatpush.msra.mxu3 %v471_v11  ;;  %v877_v49 = vld [vmem:[%s1631_s1 + $0x1e0] sm:$0xff] }
  0x30   : > { %325 = vmatpush.msra.mxu1 %v259_v14  ;;  %302 = vmatpush.msra.mxu0 %v258_v34 }
  0x31   : > { %410 = vmatpush.msra.mxu2 %v391_v50  ;;  %487 = vmatpush.msra.mxu3 %v470_v12  ;;  %v878_v50 = vld [vmem:[%s1631_s1 + $0x1e8] sm:$0xff] }
  0x32   : > { %326 = vmatpush.msra.mxu1 %v257_v15  ;;  %303 = vmatpush.msra.mxu0 %v256_v37 }
  0x33   : > { %327 = vmatmul.f32.vlgmr.msra.gmra.mxu1 %v1199_v16  ;;  %304 = vmatmul.f32.vlgmr.msra.gmra.mxu0 %v1199_v16 }
  0x34   : > { %411 = vmatpush.msra.mxu2 %v390_v51  ;;  %846 = vmatpush.msk.msrb.mxu0 %vm432_vm1, %v1316_v4  ;;  %v875_v51 = vld [vmem:[%s1631_s1 + $0x1d0] sm:$0xff] }
  0x35   : > { %488 = vmatpush.msra.mxu3 %v469_v18  ;;  %v856_v18 = vld [vmem:[%s1631_s1 + $0x138] sm:$0xff] }
  0x36   : > { %412 = vmatpush.msra.mxu2 %v389_v54  ;;  %541 = vmatpush.msra.mxu0 %v879_v47  ;;  %v874_v54 = vld [vmem:[%s1631_s1 + $0x1c8] sm:$0xff]  ;;  %v883_v47 = vld [vmem:[%s1632_s2 + $0x90] sm:$0xff] }
  0x37   : > { %489 = vmatpush.msra.mxu3 %v468_v20  ;;  %v854_v20 = vld [vmem:[%s1631_s1 + $0x128] sm:$0xff] }
  0x38   : > { %413 = vmatpush.msra.mxu2 %v388_v60  ;;  %542 = vmatpush.msra.mxu0 %v877_v49  ;;  %v867_v60 = vld [vmem:[%s1631_s1 + $0x190] sm:$0xff]  ;;  %v881_v49 = vld [vmem:[%s1632_s2 + $0x80] sm:$0xff] }
  0x39   : > { %490 = vmatpush.msra.mxu3 %v467_v24  ;;  %v850_v24 = vld [vmem:[%s1631_s1 + $0x108] sm:$0xff] }
  0x3a   : > { %414 = vmatpush.msra.mxu2 %v387_v62  ;;  %543 = vmatpush.msra.mxu0 %v875_v51  ;;  %v865_v62 = vld [vmem:[%s1631_s1 + $0x180] sm:$0xff] }
  0x3b   : > { %330 = vmatmul.f32.gmra.mxu1 %v1202_v17  ;;  %307 = vmatmul.f32.gmra.mxu0 %v1202_v17 }
  0x3c   : > { %415 = vmatpush.msra.mxu2 %v386_v63  ;;  %491 = vmatpush.msra.mxu3 %v466_v26  ;;  %v866_v63 = vld [vmem:[%s1631_s1 + $0x188] sm:$0xff]  ;;  %v895_v26 = vld [vmem:[%s1632_s2 + $0xf0] sm:$0xff] }
  0x3e   : > { %416 = vmatpush.msra.mxu2 %v385_v0  ;;  %492 = vmatpush.msra.mxu3 %v465_v42  ;;  %v863_v0 = vld [vmem:[%s1631_s1 + $0x170] sm:$0xff] }
  0x40   : > { %493 = vmatpush.msra.mxu3 %v464_v43 }
  0x42   : > { %494 = vmatpush.msra.mxu3 %v463_v44 }
  0xb0   : > { %v328_v30 = vpop.f32.mrf.mxu1  ;;  %v305_v61 = vpop.f32.mrf.mxu0 }
  0xb1   : > { %v335_v32 = vsel %vm334_vm0, %v328_v30, -inf }
  0xb2   : > { %336 = vmax.xlane.f32.xlu0 %v335_v32 }
  0xb8   : > { %v331_v35 = vpop.f32.mrf.mxu1  ;;  %v308_v2 = vpop.f32.mrf.mxu0 }
  0xb9   : > { %v338_v36 = vsel %vm334_vm0, %v331_v35, -inf }
  0xba   : > { %339 = vmax.xlane.f32.xlu0 %v338_v36 }
 0x125   : > { %v337_v45 = vpop.xlane.xlu0 %336 }
 0x126   : > { %v341_v46 = vsub.f32 %v328_v30, %v337_v45  ;;  %v462_v45 = vld [vmem:[%s1633_s3 + $0x8] sm:$0xff] }
 0x127   : > { %495 = vmatpush.msra.mxu3 %v462_v45 }
 0x128   : > { %v343_v48 = vmul.f32 1.442695, %v341_v46  ;;  %v461_v46 = vld [vmem:[%s1633_s3] sm:$0xff] }
 0x129   : > { %496 = vmatpush.msra.mxu3 %v461_v46  ;;  %v884_v46 = vld [vmem:[%s1632_s2 + $0x98] sm:$0xff] }
 0x12a   : > { %966 = vpow2.f32 %v343_v48  ;;  %v880_v48 = vld [vmem:[%s1631_s1 + $0x1f8] sm:$0xff] }
 0x12b   : > { %897 = vmatpush.msk.msrb.mxu3 %vm432_vm1, %v1316_v4  ;;  %564 = vmatpush.msrb.mxu1 %v880_v48  ;;  %v882_v48 = vld [vmem:[%s1632_s2 + $0x88] sm:$0xff] }
 0x12d   : > { %v340_v52 = vpop.xlane.xlu0 %339  ;;  %565 = vmatpush.msrb.mxu1 %v878_v50 }
 0x12e   : > { %v342_v53 = vsub.f32 %v331_v35, %v340_v52  ;;  %v876_v52 = vld [vmem:[%s1631_s1 + $0x1d8] sm:$0xff] }
 0x12f   : > { %566 = vmatpush.msrb.mxu1 %v876_v52 }
 0x130   : > { %v1293_v55 = vpop.eup %966  ;;  %v345_v56 = vmul.f32 1.442695, %v342_v53  ;;  %v873_v53 = vld [vmem:[%s1631_s1 + $0x1c0] sm:$0xff] }
 0x131   : > { %v347_v57 = vsel %vm334_vm0, %v1293_v55, 0.0  ;;  %544 = vmatpush.msra.mxu0 %v873_v53  ;;  %567 = vmatpush.msrb.mxu1 %v874_v54 }
 0x132   : > { %968 = vpow2.f32 %v345_v56  ;;  %348 = vadd.xlane.f32.xlu1 %v347_v57  ;;  %v872_v56 = vld [vmem:[%s1631_s1 + $0x1b8] sm:$0xff] }
 0x133   : > { %970 = vtanh.f32 %v305_v61  ;;  %568 = vmatpush.msrb.mxu1 %v872_v56  ;;  %v868_v61 = vld [vmem:[%s1631_s1 + $0x198] sm:$0xff] }
 0x134   : > { %972 = vtanh.f32 %v308_v2  ;;  %v861_v2 = vld [vmem:[%s1631_s1 + $0x160] sm:$0xff] }
 0x138   : > { %v1297_v58 = vpop.eup %968 }
 0x139   : > { %v350_v59 = vsel %vm334_vm0, %v1297_v58, 0.0  ;;  %v971_v1 = vpop.eup %970 }
 0x13a   : > { %351 = vadd.xlane.f32.xlu1 %v350_v59  ;;  %417 = vmatmul.f32.vlgmr.msra.gmra.mxu2 %v971_v1  ;;  %v973_v3 = vpop.eup %972  ;;  %v870_v59 = vld [vmem:[%s1631_s1 + $0x1a8] sm:$0xff]  ;;  %v864_v1 = vld [vmem:[%s1631_s1 + $0x178] sm:$0xff] }
 0x13b   : > { %569 = vmatpush.msrb.mxu1 %v870_v59 }
 0x13d   : > { %570 = vmatpush.msrb.mxu1 %v868_v61 }
 0x13f   : > { %571 = vmatpush.msrb.mxu1 %v866_v63 }
 0x141   : > { %572 = vmatpush.msrb.mxu1 %v864_v1 }
 0x142   : > { %420 = vmatmul.f32.gmra.mxu2 %v973_v3  ;;  %v862_v3 = vld [vmem:[%s1631_s1 + $0x168] sm:$0xff] }
 0x143   : > { %573 = vmatpush.msrb.mxu1 %v862_v3 }
 0x145   : > { %574 = vmatpush.msrb.mxu1 %v860_v6  ;;  %v913_v6 = vld [vmem:[%s1633_s3 + $0xe8] sm:$0xff] }
 0x147   : > { %575 = vmatpush.msrb.mxu1 %v858_v9  ;;  %v911_v9 = vld [vmem:[%s1633_s3 + $0xd8] sm:$0xff] }
 0x149   : > { %576 = vmatpush.msrb.mxu1 %v856_v18 }
 0x14b   : > { %577 = vmatpush.msrb.mxu1 %v854_v20 }
 0x1a5   : > { %v349_v8 = vpop.xlane.xlu1 %348 }
 0x1a6   : > { %974 = vrcp.f32 %v349_v8  ;;  %v364_v21 = vand.u32 2147483648, %v349_v8  ;;  %v362_v23 = vand.u32 2147483647, %v349_v8  ;;  %vm358_vm3 = vweird.f32 %v349_v8 }
 0x1a8   : > { %v365_v28 = vor.u32 1.1754944e-38, %v364_v21  ;;  %vm363_vm5 = vcmp.eq.f32.partialorder %v362_v23, 8.507059e+37  ;;  %v851_v21 = vld [vmem:[%s1631_s1 + $0x110] sm:$0xff]  ;;  %v849_v23 = vld [vmem:[%s1631_s1 + $0x100] sm:$0xff] }
 0x1ac   : > { %v975_v13 = vpop.eup %974 }
 0x1ad   : > { %v354_v14 = vmul.f32 %v975_v13, %v349_v8  ;;  %v352_v15 = vpop.xlane.xlu1 %351  ;;  %vm359_vm2 = vweird.f32 %v975_v13  ;;  %v857_v8 = vld [vmem:[%s1631_s1 + $0x140] sm:$0xff] }
 0x1ae   : > { %976 = vrcp.f32 %v352_v15  ;;  %vm360_vm4 = vmor %vm358_vm3, %vm359_vm2  ;;  %v379_v34 = vand.u32 2147483648, %v352_v15  ;;  %v377_v36 = vand.u32 2147483647, %v352_v15  ;;  %vm373_vm7 = vweird.f32 %v352_v15 }
 0x1af   : > { %v355_v19 = vsub.f32 1.0, %v354_v14 }
 0x1b0   : > { %v380_v38 = vor.u32 1.1754944e-38, %v379_v34  ;;  %vm378_vm9 = vcmp.eq.f32.partialorder %v377_v36, 8.507059e+37  ;;  %v888_v34 = vld [vmem:[%s1632_s2 + $0xb8] sm:$0xff] }
 0x1b1   : > { %v356_v22 = vmul.f32 %v975_v13, %v355_v19  ;;  %v853_v19 = vld [vmem:[%s1631_s1 + $0x120] sm:$0xff] }
 0x1b3   : > { %v357_v25 = vadd.f32 %v975_v13, %v356_v22  ;;  %v852_v22 = vld [vmem:[%s1631_s1 + $0x118] sm:$0xff] }
 0x1b4   : > { %v977_v27 = vpop.eup %976  ;;  %578 = vmatpush.msrb.mxu1 %v852_v22 }
 0x1b5   : > { %v369_v29 = vmul.f32 %v977_v27, %v352_v15  ;;  %v361_v30 = vsel %vm360_vm4, %v975_v13, %v357_v25  ;;  %vm374_vm6 = vweird.f32 %v977_v27  ;;  %v855_v15 = vld [vmem:[%s1631_s1 + $0x130] sm:$0xff]  ;;  %v896_v25 = vld [vmem:[%s1632_s2 + $0xf8] sm:$0xff] }
 0x1b6   : > { %v366_v31 = vsel %vm363_vm5, %v365_v28, %v361_v30  ;;  %vm375_vm8 = vmor %vm373_vm7, %vm374_vm6  ;;  %579 = vmatpush.msrb.mxu1 %v850_v24  ;;  %654 = vmatpush.msrb.mxu2 %v896_v25  ;;  %v893_v28 = vld [vmem:[%s1632_s2 + $0xe0] sm:$0xff]  ;;  %v891_v30 = vld [vmem:[%s1632_s2 + $0xd0] sm:$0xff] }
 0x1b7   : > { %v370_v32 = vsub.f32 1.0, %v369_v29  ;;  %v367_v33 = vmul.f32 %v1293_v55, %v366_v31  ;;  %v871_v55 = vld [vmem:[%s1631_s1 + $0x1b0] sm:$0xff]  ;;  %v892_v29 = vld [vmem:[%s1632_s2 + $0xd8] sm:$0xff]  ;;  %v890_v31 = vld [vmem:[%s1632_s2 + $0xc8] sm:$0xff] }
 0x1b8   : > { %545 = vmatpush.msra.mxu0 %v871_v55  ;;  %655 = vmatpush.msrb.mxu2 %v895_v26  ;;  %v905_v25 = vld [vmem:[%s1633_s3 + $0xa8] sm:$0xff] }
 0x1b9   : > { %v371_v35 = vmul.f32 %v977_v27, %v370_v32  ;;  %847 = vmatmul.msk.f32.vlgmr.msrb.gmra.mxu0 %vm334_vm0, %v367_v33  ;;  %v889_v32 = vld [vmem:[%s1632_s2 + $0xc0] sm:$0xff] }
 0x1ba   : > { %v964_v33 = vld [vmem:[%s1634_s4] ss:$0 sm:$0xff] }
 0x1bb   : > { %v372_v37 = vadd.f32 %v977_v27, %v371_v35  ;;  %v887_v35 = vld [vmem:[%s1632_s2 + $0xb0] sm:$0xff] }
 0x1bd   : > { %v376_v39 = vsel %vm375_vm8, %v977_v27, %v372_v37  ;;  %v418_v57 = vpop.f32.mrf.mxu2  ;;  %v894_v27 = vld [vmem:[%s1632_s2 + $0xe8] sm:$0xff] }
 0x1be   : > { %v381_v40 = vsel %vm378_vm9, %v380_v38, %v376_v39  ;;  %978 = vtanh.f32 %v418_v57  ;;  %656 = vmatpush.msrb.mxu2 %v894_v27  ;;  %v886_v38 = vld [vmem:[%s1632_s2 + $0xa8] sm:$0xff] }
 0x1bf   : > { %v382_v41 = vmul.f32 %v1297_v58, %v381_v40  ;;  %v869_v58 = vld [vmem:[%s1631_s1 + $0x1a0] sm:$0xff] }
 0x1c0   : > { %546 = vmatpush.msra.mxu0 %v869_v58  ;;  %657 = vmatpush.msrb.mxu2 %v893_v28  ;;  %v885_v40 = vld [vmem:[%s1632_s2 + $0xa0] sm:$0xff] }
 0x1c1   : > { %848 = vmatmul.msk.f32.gmra.mxu0 %vm334_vm0, %v382_v41 }
 0x1c2   : > { %547 = vmatpush.msra.mxu0 %v867_v60  ;;  %658 = vmatpush.msrb.mxu2 %v892_v29 }
 0x1c4   : > { %548 = vmatpush.msra.mxu0 %v865_v62  ;;  %v979_v7 = vpop.eup %978  ;;  %659 = vmatpush.msrb.mxu2 %v891_v30  ;;  %v904_v30 = vld [vmem:[%s1633_s3 + $0xa0] sm:$0xff] }
 0x1c5   : > { %v421_v4 = vpop.f32.mrf.mxu2 }
 0x1c6   : > { %549 = vmatpush.msra.mxu0 %v863_v0  ;;  %980 = vtanh.f32 %v421_v4  ;;  %660 = vmatpush.msrb.mxu2 %v890_v31  ;;  %v915_v4 = vld [vmem:[%s1633_s3 + $0xf8] sm:$0xff] }
 0x1c8   : > { %550 = vmatpush.msra.mxu0 %v861_v2  ;;  %661 = vmatpush.msrb.mxu2 %v889_v32 }
 0x1ca   : > { %551 = vmatpush.msra.mxu0 %v859_v5  ;;  %662 = vmatpush.msrb.mxu2 %v888_v34  ;;  %v914_v5 = vld [vmem:[%s1633_s3 + $0xf0] sm:$0xff]  ;;  %v903_v34 = vld [vmem:[%s1633_s3 + $0x98] sm:$0xff] }
 0x1cc   : > { %552 = vmatpush.msra.mxu0 %v857_v8  ;;  %v981_v12 = vpop.eup %980  ;;  %663 = vmatpush.msrb.mxu2 %v887_v35  ;;  %v912_v8 = vld [vmem:[%s1633_s3 + $0xe0] sm:$0xff] }
 0x1ce   : > { %553 = vmatpush.msra.mxu0 %v855_v15  ;;  %664 = vmatpush.msrb.mxu2 %v886_v38  ;;  %v908_v15 = vld [vmem:[%s1633_s3 + $0xc0] sm:$0xff]  ;;  %v902_v38 = vld [vmem:[%s1633_s3 + $0x90] sm:$0xff] }
 0x1d0   : > { %554 = vmatpush.msra.mxu0 %v853_v19  ;;  %665 = vmatpush.msrb.mxu2 %v885_v40  ;;  %v907_v19 = vld [vmem:[%s1633_s3 + $0xb8] sm:$0xff] }
 0x1d2   : > { %555 = vmatpush.msra.mxu0 %v851_v21  ;;  %666 = vmatpush.msrb.mxu2 %v884_v46  ;;  %v901_v46 = vld [vmem:[%s1633_s3 + $0x88] sm:$0xff] }
 0x1d4   : > { %556 = vmatpush.msra.mxu0 %v849_v23  ;;  %667 = vmatpush.msrb.mxu2 %v883_v47  ;;  %v906_v23 = vld [vmem:[%s1633_s3 + $0xb0] sm:$0xff]  ;;  %v900_v47 = vld [vmem:[%s1633_s3 + $0x80] sm:$0xff] }
 0x1d6   : > { %668 = vmatpush.msrb.mxu2 %v882_v48 }
 0x1d8   : > { %669 = vmatpush.msrb.mxu2 %v881_v49 }
 0x236   : > { %v453_v10 = vpop.f32.mrf.mxu0 }
 0x237   : > { %v459_v11 = vmul.f32 %v979_v7, %v453_v10  ;;  %v910_v10 = vld [vmem:[%s1633_s3 + $0xd0] sm:$0xff] }
 0x239   : > { %497 = vmatmul.f32.vlgmr.msra.gmra.mxu3 %v459_v11  ;;  %v909_v11 = vld [vmem:[%s1633_s3 + $0xc8] sm:$0xff] }
 0x23a   : > { %732 = vmatpush.msra.mxu3 %v915_v4 }
 0x23c   : > { %733 = vmatpush.msra.mxu3 %v914_v5 }
 0x23e   : > { %v456_v13 = vpop.f32.mrf.mxu0  ;;  %734 = vmatpush.msra.mxu3 %v913_v6 }
 0x23f   : > { %v460_v14 = vmul.f32 %v981_v12, %v456_v13 }
 0x240   : > { %735 = vmatpush.msra.mxu3 %v912_v8 }
 0x241   : > { %500 = vmatmul.f32.gmra.mxu3 %v460_v14 }
 0x242   : > { %736 = vmatpush.msra.mxu3 %v911_v9 }
 0x244   : > { %737 = vmatpush.msra.mxu3 %v910_v10 }
 0x246   : > { %738 = vmatpush.msra.mxu3 %v909_v11 }
 0x248   : > { %739 = vmatpush.msra.mxu3 %v908_v15 }
 0x24a   : > { %740 = vmatpush.msra.mxu3 %v907_v19 }
 0x24c   : > { %741 = vmatpush.msra.mxu3 %v906_v23 }
 0x24e   : > { %742 = vmatpush.msra.mxu3 %v905_v25 }
 0x250   : > { %743 = vmatpush.msra.mxu3 %v904_v30 }
 0x252   : > { %744 = vmatpush.msra.mxu3 %v903_v34 }
 0x254   : > { %745 = vmatpush.msra.mxu3 %v902_v38 }
 0x256   : > { %746 = vmatpush.msra.mxu3 %v901_v46 }
 0x258   : > { %747 = vmatpush.msra.mxu3 %v900_v47 }
 0x2bc   : > { %v498_v36 = vpop.f32.mrf.mxu3 }
 0x2bd   : > { %v499_v37 = vadd.f32 %v964_v33, %v498_v36 }
 0x2bf   : > { %v504_v39 = vmul.f32 %v499_v37, %v1199_v16 }
 0x2c1   : > { %v1511_v41 = vadd.f32 %v504_v39, %v1199_v16 }
 0x2c3   : > { %557 = vmatmul.f32.vlgmr.msra.gmra.mxu0 %v1511_v41  ;;  %580 = vmatmul.f32.vlgmr.msrb.gmra.mxu1 %v1511_v41 }
 0x2c4   : > { %v501_v42 = vpop.f32.mrf.mxu3 }
 0x2c5   : > { %v502_v43 = vadd.f32 %v964_v33, %v501_v42 }
 0x2c7   : > { %v505_v44 = vmul.f32 %v502_v43, %v1202_v17 }
 0x2c9   : > { %v1517_v45 = vadd.f32 %v505_v44, %v1202_v17 }
 0x2cb   : > { %560 = vmatmul.f32.gmra.mxu0 %v1517_v45  ;;  %583 = vmatmul.f32.gmra.mxu1 %v1517_v45 }
 0x340   : > { %v558_v50 = vpop.f32.mrf.mxu0  ;;  %v581_v51 = vpop.f32.mrf.mxu1 }
 0x341   : > { %982 = vtanh.f32 %v558_v50  ;;  %v587_v52 = vsel %vm334_vm0, %v581_v51, -inf }
 0x342   : > { %588 = vmax.xlane.f32.xlu2 %v587_v52 }
 0x347   : > { %v983_v53 = vpop.eup %982 }
 0x348   : > { %v561_v54 = vpop.f32.mrf.mxu0  ;;  %v584_v55 = vpop.f32.mrf.mxu1  ;;  %670 = vmatmul.f32.vlgmr.msrb.gmra.mxu2 %v983_v53 }
 0x349   : > { %984 = vtanh.f32 %v561_v54  ;;  %v590_v56 = vsel %vm334_vm0, %v584_v55, -inf }
 0x34a   : > { %591 = vmax.xlane.f32.xlu2 %v590_v56  ;;  %v965_v56 = vld [vmem:[%s1634_s4 + $0x1] ss:$0 sm:$0xff] }
 0x34f   : > { %v985_v57 = vpop.eup %984 }
 0x350   : > { %673 = vmatmul.f32.gmra.mxu2 %v985_v57 }
 0x3b5   : > { %v589_v58 = vpop.xlane.xlu2 %588 }
 0x3b6   : > { %v593_v59 = vsub.f32 %v581_v51, %v589_v58 }
 0x3b8   : > { %v595_v60 = vmul.f32 1.442695, %v593_v59 }
 0x3ba   : > { %986 = vpow2.f32 %v595_v60 }
 0x3bd   : > { %v592_v61 = vpop.xlane.xlu2 %591 }
 0x3be   : > { %v594_v62 = vsub.f32 %v584_v55, %v592_v61 }
 0x3c0   : > { %v987_v63 = vpop.eup %986  ;;  %v597_v0 = vmul.f32 1.442695, %v594_v62 }
 0x3c1   : > { %v599_v1 = vsel %vm334_vm0, %v987_v63, 0.0 }
 0x3c2   : > { %988 = vpow2.f32 %v597_v0  ;;  %600 = vadd.xlane.f32.xlu0 %v599_v1 }
 0x3c8   : > { %v1536_v2 = vpop.eup %988 }
 0x3c9   : > { %v602_v3 = vsel %vm334_vm0, %v1536_v2, 0.0 }
 0x3ca   : > { %603 = vadd.xlane.f32.xlu1 %v602_v3 }
 0x3cb   : > { %v671_v48 = vpop.f32.mrf.mxu2 }
 0x3d3   : > { %v674_v49 = vpop.f32.mrf.mxu2 }
 0x435   : > { %v601_v7 = vpop.xlane.xlu0 %600 }
 0x436   : > { %990 = vrcp.f32 %v601_v7  ;;  %v616_v20 = vand.u32 2147483648, %v601_v7  ;;  %v614_v22 = vand.u32 2147483647, %v601_v7  ;;  %vm610_vm11 = vweird.f32 %v601_v7 }
 0x438   : > { %v617_v27 = vor.u32 1.1754944e-38, %v616_v20  ;;  %vm615_vm13 = vcmp.eq.f32.partialorder %v614_v22, 8.507059e+37 }
 0x43c   : > { %v991_v12 = vpop.eup %990 }
 0x43d   : > { %v606_v13 = vmul.f32 %v991_v12, %v601_v7  ;;  %v604_v14 = vpop.xlane.xlu1 %603  ;;  %vm611_vm10 = vweird.f32 %v991_v12 }
 0x43e   : > { %992 = vrcp.f32 %v604_v14  ;;  %vm612_vm12 = vmor %vm610_vm11, %vm611_vm10  ;;  %v631_v35 = vand.u32 2147483648, %v604_v14  ;;  %v629_v37 = vand.u32 2147483647, %v604_v14  ;;  %vm625_vm15 = vweird.f32 %v604_v14 }
 0x43f   : > { %v607_v18 = vsub.f32 1.0, %v606_v13  ;;  %994 = vtanh.f32 %v671_v48 }
 0x440   : > { %v632_v40 = vor.u32 1.1754944e-38, %v631_v35  ;;  %vm630_vm2 = vcmp.eq.f32.partialorder %v629_v37, 8.507059e+37  ;;  %996 = vtanh.f32 %v674_v49 }
 0x441   : > { %v608_v21 = vmul.f32 %v991_v12, %v607_v18 }
 0x443   : > { %v609_v24 = vadd.f32 %v991_v12, %v608_v21 }
 0x444   : > { %v993_v26 = vpop.eup %992 }
 0x445   : > { %v613_v28 = vsel %vm612_vm12, %v991_v12, %v609_v24  ;;  %v621_v29 = vmul.f32 %v993_v26, %v604_v14  ;;  %vm626_vm14 = vweird.f32 %v993_v26  ;;  %v995_v50 = vpop.eup %994 }
 0x446   : > { %v618_v31 = vsel %vm615_vm13, %v617_v27, %v613_v28  ;;  %vm627_vm1 = vmor %vm625_vm15, %vm626_vm14  ;;  %v997_v53 = vpop.eup %996 }
 0x447   : > { %v622_v32 = vsub.f32 1.0, %v621_v29  ;;  %v619_v33 = vmul.f32 %v987_v63, %v618_v31 }
 0x449   : > { %v623_v36 = vmul.f32 %v993_v26, %v622_v32  ;;  %898 = vmatmul.msk.f32.vlgmr.msrb.gmra.mxu3 %vm334_vm0, %v619_v33 }
 0x44b   : > { %v624_v39 = vadd.f32 %v993_v26, %v623_v36 }
 0x44d   : > { %v628_v42 = vsel %vm627_vm1, %v993_v26, %v624_v39 }
 0x44e   : > { %v633_v43 = vsel %vm630_vm2, %v632_v40, %v628_v42 }
 0x44f   : > { %v634_v44 = vmul.f32 %v1536_v2, %v633_v43 }
 0x451   : > { %899 = vmatmul.msk.f32.gmra.mxu3 %vm334_vm0, %v634_v44 }
 0x4cc   : > { %v702_v51 = vpop.f32.mrf.mxu3 }
 0x4cd   : > { %v708_v52 = vmul.f32 %v995_v50, %v702_v51 }
 0x4cf   : > { %748 = vmatmul.f32.vlgmr.msra.gmra.mxu3 %v708_v52 }
 0x4d4   : > { %v705_v54 = vpop.f32.mrf.mxu3 }
 0x4d5   : > { %v709_v55 = vmul.f32 %v997_v53, %v705_v54 }
 0x4d7   : > { %751 = vmatmul.f32.gmra.mxu3 %v709_v55 }
 0x552   : > { %v749_v57 = vpop.f32.mrf.mxu3 }
 0x553   : > { %v750_v58 = vadd.f32 %v965_v56, %v749_v57 }
 0x555   : > { %v755_v59 = vmul.f32 %v750_v58, %v1199_v16 }
 0x557   : > { %v757_v60 = vadd.f32 %v755_v59, %v1511_v41 }
 0x559   : > { %759 = vst [vmem:[%s245_s13] sm:$0xff] %v757_v60 }
 0x55a   : > { %v752_v61 = vpop.f32.mrf.mxu3 }
 0x55b   : > { %v753_v62 = vadd.f32 %v965_v56, %v752_v61 }
 0x55d   : > { %v756_v63 = vmul.f32 %v753_v62, %v1202_v17 }
 0x55f   : > { %v758_v16 = vadd.f32 %v756_v63, %v1517_v45 }
 0x561   : > { %760 = vst [vmem:[%s245_s13 + $0x8] sm:$0xff] %v758_v16 }
 0x562   : > { %1025 = shalt.err (!%p1022_p3)
}
 0x563   : > { %s1062_s26 = smov 128   ;;  %s1063_s29 = smov 8  }
 0x564   : > { %923 = dma.vmem_to_hbm [thread:$0]  (%p1137_p5), %s775_s14, 256, %s777_s15, %s762_s25, %s1062_s26, %s1062_s26, %s1063_s29  }
 0x565 PF: > { %p929_p4 = scmp.ge.s32.totalorder %s1060_s24, 2  ;;  %s791_s9 = sand.u32 1, %s1048_s21  }
 0x566   : > { %s792_s11 = scalar_lea.sflag [#allocation3], %s791_s9 }
 0x567   : > { %p926_p7 = pnand %p929_p4, %p1141_p6 }
 0x569   : > { %p927_p8 = pneg %p926_p7 }
 0x56b   : > { %1043 = dma.done.wait (%p927_p8), %s792_s11, 256  }
 0x56c   : > { %1045 = vsyncadd (%p927_p8), %s792_s11, 4294967040  ;;  %p16_p9 = scmp.ge.s32.totalorder %s1124_s27, 4   ;;  %s1639_s21 = smov %s1052_s22 }
 0x56d   : > { %s1640_s22 = smov %s1056_s23  ;;  %s1641_s23 = smov %s1135_s30 }
 0x56e   : > { %s1642_s24 = smov %s1124_s27  ;;  %18 = sbr.rel (!%p16_p9) target bundleno = 3 (0x3), region = 83 }
 0x573   :  { %798 = vsyncpa [#allocation3], 1 }
 0x574   :  { %800 = vsyncpa [#allocation3 + $0x1], 1 }

</bundles_post_ra>
